<compile_context>
chip_gen: v5e
topology: v5e:2x2
jax: 0.10.0
libtpu: 0.0.40
codegen_flags: <defaults>
</compile_context>

<pallas_src>
import functools

import jax
import jax.numpy as jnp
from jax.experimental import pallas as pl
from jax.experimental.pallas import tpu as pltpu

KH = KW = 7
PAD = 3
CAT_CH = 2  # forward() always feeds a 2-channel (avg, max) map into the conv


def _sa_kernel(x_ref, w_ref, b_ref, o_ref, pad_ref, *, C, H, W, Cout, Nb, SUB):
    # x_ref  : (Nb, C, H*W)      VMEM block (Nb batch rows, spatial flattened)
    # w_ref  : (Cout*2*7*7,)     SMEM (flattened OIHW conv weights)
    # b_ref  : (Cout,)           SMEM (conv bias)
    # o_ref  : (Nb, Cout, H*W)   VMEM block
    # pad_ref: (2, SUB, L)       VMEM scratch; L = H*W + 2*B, B = PAD*(W+1)
    del C
    HW = H * W
    B = PAD * W + PAD          # flat offset of map element (0,0) inside a padded map
    L = HW + 2 * B
    f32 = jnp.float32

    # ---- hoist all SMEM scalar reads out of the loops ------------------------
    wv = [[[[w_ref[((co * CAT_CH + ci) * KH + kh) * KW + kw]
             for kw in range(KW)]
            for kh in range(KH)]
           for ci in range(CAT_CH)]
          for co in range(Cout)]
    bias = [b_ref[co] for co in range(Cout)]

    # ---- per-kw column-validity masks (zero padding in the W direction) ------
    col = jax.lax.broadcasted_iota(jnp.int32, (1, HW), 1)
    col = (col & (W - 1)) if (W & (W - 1)) == 0 else (col % W)
    masks = [((col + (kw - PAD)) >= 0) & ((col + (kw - PAD)) < W)
             for kw in range(KW)]

    # ---- zero only the borders of the padded scratch -------------------------
    # (the interior [B, B+HW) is fully overwritten by every sub-iteration below,
    #  which is what makes skipping a full re-zero safe)
    pad_ref[:, :, :B] = jnp.zeros((CAT_CH, SUB, B), f32)
    pad_ref[:, :, B + HW:] = jnp.zeros((CAT_CH, SUB, B), f32)

    def sub_body(j, carry):
        r0 = j * SUB
        x = x_ref[pl.ds(r0, SUB)].astype(f32)             # (SUB, C, HW)

        # channel reduction -> padded (in H) flattened maps
        pad_ref[0, :, B:B + HW] = jnp.mean(x, axis=1)     # avg map
        pad_ref[1, :, B:B + HW] = jnp.max(x, axis=1)      # max map

        # load each padded map into registers ONCE; all taps are value slices
        pmaps = [pad_ref[0], pad_ref[1]]                  # each (SUB, L)

        # per-(co, kw) partial sums; each tap slice is reused across co
        parts = [[None] * KW for _ in range(Cout)]
        for kw in range(KW):
            for ci in range(CAT_CH):
                p = pmaps[ci]
                for kh in range(KH):
                    s = kh * W + kw
                    tap = p[:, s:s + HW]                  # (SUB, HW) value slice
                    for co in range(Cout):
                        t = wv[co][ci][kh][kw] * tap
                        parts[co][kw] = t if parts[co][kw] is None else parts[co][kw] + t

        for co in range(Cout):
            masked = [jnp.where(masks[kw], parts[co][kw], 0.0) for kw in range(KW)]
            tot = masked[0]
            for q in masked[1:]:
                tot = tot + q
            tot = tot + bias[co]
            o_ref[pl.ds(r0, SUB), co, :] = jax.nn.sigmoid(tot).astype(o_ref.dtype)
        return carry

    n_sub = Nb // SUB
    if n_sub == 1:
        sub_body(0, 0)
    else:
        jax.lax.fori_loop(0, n_sub, sub_body, 0)


def _choose_blocking(N, C, HW, itemsize=4, target_bytes=2 << 20):
    """Pick (Nb, SUB).  Nb = batch rows per grid step: divides N, keeps the
    input block around `target_bytes`, and keeps >= 2 grid steps when N >= 2 so
    the 'parallel' grid axis can shard across TensorCores on multi-core chips.
    SUB = rows per inner sub-iteration (bounds vreg pressure)."""
    per_row = max(1, C * HW * itemsize)
    cap = max(1, target_bytes // per_row)
    nb = 1
    for d in range(1, N + 1):
        if N % d == 0 and d <= cap:
            nb = d
    if N >= 2 and N // nb < 2:
        for d in range(nb, 0, -1):
            if N % d == 0 and N // d >= 2:
                nb = d
                break
    sub = 1
    for d in range(1, min(8, nb) + 1):
        if nb % d == 0:
            sub = d
    return nb, sub


def sa_module_forward(x, w, b):
    """x: (N, C, H, W); w: (Cout, 2, 7, 7); b: (Cout,)."""
    N, C, H, W = x.shape
    Cout = w.shape[0]
    assert w.shape == (Cout, CAT_CH, KH, KW)
    HW = H * W
    L = HW + 2 * (PAD * W + PAD)

    Nb, SUB = _choose_blocking(N, C, HW, jnp.dtype(x.dtype).itemsize)

    x_flat = x.reshape(N, C, HW)                 # lane-dense spatial layout
    w_flat = w.reshape(-1).astype(jnp.float32)
    b = b.astype(jnp.float32)

    kernel = functools.partial(_sa_kernel, C=C, H=H, W=W, Cout=Cout, Nb=Nb, SUB=SUB)
    out = pl.pallas_call(
        kernel,
        out_shape=jax.ShapeDtypeStruct((N, Cout, HW), x.dtype),
        grid_spec=pltpu.PrefetchScalarGridSpec(
            num_scalar_prefetch=0,
            grid=(N // Nb,),
            in_specs=[
                pl.BlockSpec((Nb, C, HW), lambda n: (n, 0, 0)),
                pl.BlockSpec(memory_space=pltpu.MemorySpace.SMEM),
                pl.BlockSpec(memory_space=pltpu.MemorySpace.SMEM),
            ],
            out_specs=pl.BlockSpec((Nb, Cout, HW), lambda n: (n, 0, 0)),
            scratch_shapes=[pltpu.VMEM((CAT_CH, SUB, L), jnp.float32)],
        ),
        compiler_params=pltpu.CompilerParams(
            dimension_semantics=("parallel",)),
    )(x_flat, w_flat, b)
    return out.reshape(N, Cout, H, W)


def sa_module_reference(x, w, b):
    avg = jnp.mean(x, axis=1, keepdims=True)
    mx = jnp.max(x, axis=1, keepdims=True)
    y = jnp.concatenate([avg, mx], axis=1)
    out = jax.lax.conv_general_dilated(
        y, w, window_strides=(1, 1), padding=((PAD, PAD), (PAD, PAD)),
        dimension_numbers=("NCHW", "OIHW", "NCHW"))
    out = out + b[None, :, None, None]
    return jax.nn.sigmoid(out)


if __name__ == "__main__":
    # SAModule(in_channels=2, out_channels=1): forward() always builds a
    # 2-channel avg/max map, so in_channels must be 2.
    N, C, H, W = 2, 4, 16, 16
    Cout = 1

    key = jax.random.PRNGKey(0)
    kx, kw_, kb = jax.random.split(key, 3)
    x = jax.random.normal(kx, (N, C, H, W), dtype=jnp.float32)
    w = 0.1 * jax.random.normal(kw_, (Cout, CAT_CH, KH, KW), dtype=jnp.float32)
    b = 0.1 * jax.random.normal(kb, (Cout,), dtype=jnp.float32)

    out = sa_module_forward(x, w, b)
    out = jax.block_until_ready(out)

    ref = sa_module_reference(x, w, b)
    assert out.shape == (N, Cout, H, W)
    assert jnp.allclose(out, ref, atol=1e-5, rtol=1e-4), "mismatch vs reference"

    print("KERNEL_OK")
</pallas_src>

<mosaic_0001>
module attributes {stable_mosaic.version = 11 : i64} {
  func.func @_sa_kernel(%arg0: i32, %arg1: memref<1x4x256xf32, #tpu.memory_space<vmem>>, %arg2: memref<98xf32, #tpu.memory_space<smem>>, %arg3: memref<1xf32, #tpu.memory_space<smem>>, %arg4: memref<1x1x256xf32, #tpu.memory_space<vmem>>, %arg5: memref<2x1x358xf32, #tpu.memory_space<vmem>>) attributes {dimension_semantics = [#tpu.dimension_semantics<parallel>], iteration_bounds = array<i64: 2>, scalar_prefetch = 0 : i64, scratch_operands = 1 : i64, tpu.core_type = #tpu.core_type<tc>, window_params = [{transform_indices = @transform_0, window_bounds = array<i64: 1, 4, 256>}, {transform_indices = @transform_1, window_bounds = array<i64: 98>}, {transform_indices = @transform_2, window_bounds = array<i64: 1>}, {transform_indices = @transform_3, window_bounds = array<i64: 1, 1, 256>}]} {
    %c0 = arith.constant 0 : index
    %0 = memref.load %arg2[%c0] : memref<98xf32, #tpu.memory_space<smem>>
    %c1 = arith.constant 1 : index
    %1 = memref.load %arg2[%c1] : memref<98xf32, #tpu.memory_space<smem>>
    %c2 = arith.constant 2 : index
    %2 = memref.load %arg2[%c2] : memref<98xf32, #tpu.memory_space<smem>>
    %c3 = arith.constant 3 : index
    %3 = memref.load %arg2[%c3] : memref<98xf32, #tpu.memory_space<smem>>
    %c4 = arith.constant 4 : index
    %4 = memref.load %arg2[%c4] : memref<98xf32, #tpu.memory_space<smem>>
    %c5 = arith.constant 5 : index
    %5 = memref.load %arg2[%c5] : memref<98xf32, #tpu.memory_space<smem>>
    %c6 = arith.constant 6 : index
    %6 = memref.load %arg2[%c6] : memref<98xf32, #tpu.memory_space<smem>>
    %c7 = arith.constant 7 : index
    %7 = memref.load %arg2[%c7] : memref<98xf32, #tpu.memory_space<smem>>
    %c8 = arith.constant 8 : index
    %8 = memref.load %arg2[%c8] : memref<98xf32, #tpu.memory_space<smem>>
    %c9 = arith.constant 9 : index
    %9 = memref.load %arg2[%c9] : memref<98xf32, #tpu.memory_space<smem>>
    %c10 = arith.constant 10 : index
    %10 = memref.load %arg2[%c10] : memref<98xf32, #tpu.memory_space<smem>>
    %c11 = arith.constant 11 : index
    %11 = memref.load %arg2[%c11] : memref<98xf32, #tpu.memory_space<smem>>
    %c12 = arith.constant 12 : index
    %12 = memref.load %arg2[%c12] : memref<98xf32, #tpu.memory_space<smem>>
    %c13 = arith.constant 13 : index
    %13 = memref.load %arg2[%c13] : memref<98xf32, #tpu.memory_space<smem>>
    %c14 = arith.constant 14 : index
    %14 = memref.load %arg2[%c14] : memref<98xf32, #tpu.memory_space<smem>>
    %c15 = arith.constant 15 : index
    %15 = memref.load %arg2[%c15] : memref<98xf32, #tpu.memory_space<smem>>
    %c16 = arith.constant 16 : index
    %16 = memref.load %arg2[%c16] : memref<98xf32, #tpu.memory_space<smem>>
    %c17 = arith.constant 17 : index
    %17 = memref.load %arg2[%c17] : memref<98xf32, #tpu.memory_space<smem>>
    %c18 = arith.constant 18 : index
    %18 = memref.load %arg2[%c18] : memref<98xf32, #tpu.memory_space<smem>>
    %c19 = arith.constant 19 : index
    %19 = memref.load %arg2[%c19] : memref<98xf32, #tpu.memory_space<smem>>
    %c20 = arith.constant 20 : index
    %20 = memref.load %arg2[%c20] : memref<98xf32, #tpu.memory_space<smem>>
    %c21 = arith.constant 21 : index
    %21 = memref.load %arg2[%c21] : memref<98xf32, #tpu.memory_space<smem>>
    %c22 = arith.constant 22 : index
    %22 = memref.load %arg2[%c22] : memref<98xf32, #tpu.memory_space<smem>>
    %c23 = arith.constant 23 : index
    %23 = memref.load %arg2[%c23] : memref<98xf32, #tpu.memory_space<smem>>
    %c24 = arith.constant 24 : index
    %24 = memref.load %arg2[%c24] : memref<98xf32, #tpu.memory_space<smem>>
    %c25 = arith.constant 25 : index
    %25 = memref.load %arg2[%c25] : memref<98xf32, #tpu.memory_space<smem>>
    %c26 = arith.constant 26 : index
    %26 = memref.load %arg2[%c26] : memref<98xf32, #tpu.memory_space<smem>>
    %c27 = arith.constant 27 : index
    %27 = memref.load %arg2[%c27] : memref<98xf32, #tpu.memory_space<smem>>
    %c28 = arith.constant 28 : index
    %28 = memref.load %arg2[%c28] : memref<98xf32, #tpu.memory_space<smem>>
    %c29 = arith.constant 29 : index
    %29 = memref.load %arg2[%c29] : memref<98xf32, #tpu.memory_space<smem>>
    %c30 = arith.constant 30 : index
    %30 = memref.load %arg2[%c30] : memref<98xf32, #tpu.memory_space<smem>>
    %c31 = arith.constant 31 : index
    %31 = memref.load %arg2[%c31] : memref<98xf32, #tpu.memory_space<smem>>
    %c32 = arith.constant 32 : index
    %32 = memref.load %arg2[%c32] : memref<98xf32, #tpu.memory_space<smem>>
    %c33 = arith.constant 33 : index
    %33 = memref.load %arg2[%c33] : memref<98xf32, #tpu.memory_space<smem>>
    %c34 = arith.constant 34 : index
    %34 = memref.load %arg2[%c34] : memref<98xf32, #tpu.memory_space<smem>>
    %c35 = arith.constant 35 : index
    %35 = memref.load %arg2[%c35] : memref<98xf32, #tpu.memory_space<smem>>
    %c36 = arith.constant 36 : index
    %36 = memref.load %arg2[%c36] : memref<98xf32, #tpu.memory_space<smem>>
    %c37 = arith.constant 37 : index
    %37 = memref.load %arg2[%c37] : memref<98xf32, #tpu.memory_space<smem>>
    %c38 = arith.constant 38 : index
    %38 = memref.load %arg2[%c38] : memref<98xf32, #tpu.memory_space<smem>>
    %c39 = arith.constant 39 : index
    %39 = memref.load %arg2[%c39] : memref<98xf32, #tpu.memory_space<smem>>
    %c40 = arith.constant 40 : index
    %40 = memref.load %arg2[%c40] : memref<98xf32, #tpu.memory_space<smem>>
    %c41 = arith.constant 41 : index
    %41 = memref.load %arg2[%c41] : memref<98xf32, #tpu.memory_space<smem>>
    %c42 = arith.constant 42 : index
    %42 = memref.load %arg2[%c42] : memref<98xf32, #tpu.memory_space<smem>>
    %c43 = arith.constant 43 : index
    %43 = memref.load %arg2[%c43] : memref<98xf32, #tpu.memory_space<smem>>
    %c44 = arith.constant 44 : index
    %44 = memref.load %arg2[%c44] : memref<98xf32, #tpu.memory_space<smem>>
    %c45 = arith.constant 45 : index
    %45 = memref.load %arg2[%c45] : memref<98xf32, #tpu.memory_space<smem>>
    %c46 = arith.constant 46 : index
    %46 = memref.load %arg2[%c46] : memref<98xf32, #tpu.memory_space<smem>>
    %c47 = arith.constant 47 : index
    %47 = memref.load %arg2[%c47] : memref<98xf32, #tpu.memory_space<smem>>
    %c48 = arith.constant 48 : index
    %48 = memref.load %arg2[%c48] : memref<98xf32, #tpu.memory_space<smem>>
    %c49 = arith.constant 49 : index
    %49 = memref.load %arg2[%c49] : memref<98xf32, #tpu.memory_space<smem>>
    %c50 = arith.constant 50 : index
    %50 = memref.load %arg2[%c50] : memref<98xf32, #tpu.memory_space<smem>>
    %c51 = arith.constant 51 : index
    %51 = memref.load %arg2[%c51] : memref<98xf32, #tpu.memory_space<smem>>
    %c52 = arith.constant 52 : index
    %52 = memref.load %arg2[%c52] : memref<98xf32, #tpu.memory_space<smem>>
    %c53 = arith.constant 53 : index
    %53 = memref.load %arg2[%c53] : memref<98xf32, #tpu.memory_space<smem>>
    %c54 = arith.constant 54 : index
    %54 = memref.load %arg2[%c54] : memref<98xf32, #tpu.memory_space<smem>>
    %c55 = arith.constant 55 : index
    %55 = memref.load %arg2[%c55] : memref<98xf32, #tpu.memory_space<smem>>
    %c56 = arith.constant 56 : index
    %56 = memref.load %arg2[%c56] : memref<98xf32, #tpu.memory_space<smem>>
    %c57 = arith.constant 57 : index
    %57 = memref.load %arg2[%c57] : memref<98xf32, #tpu.memory_space<smem>>
    %c58 = arith.constant 58 : index
    %58 = memref.load %arg2[%c58] : memref<98xf32, #tpu.memory_space<smem>>
    %c59 = arith.constant 59 : index
    %59 = memref.load %arg2[%c59] : memref<98xf32, #tpu.memory_space<smem>>
    %c60 = arith.constant 60 : index
    %60 = memref.load %arg2[%c60] : memref<98xf32, #tpu.memory_space<smem>>
    %c61 = arith.constant 61 : index
    %61 = memref.load %arg2[%c61] : memref<98xf32, #tpu.memory_space<smem>>
    %c62 = arith.constant 62 : index
    %62 = memref.load %arg2[%c62] : memref<98xf32, #tpu.memory_space<smem>>
    %c63 = arith.constant 63 : index
    %63 = memref.load %arg2[%c63] : memref<98xf32, #tpu.memory_space<smem>>
    %c64 = arith.constant 64 : index
    %64 = memref.load %arg2[%c64] : memref<98xf32, #tpu.memory_space<smem>>
    %c65 = arith.constant 65 : index
    %65 = memref.load %arg2[%c65] : memref<98xf32, #tpu.memory_space<smem>>
    %c66 = arith.constant 66 : index
    %66 = memref.load %arg2[%c66] : memref<98xf32, #tpu.memory_space<smem>>
    %c67 = arith.constant 67 : index
    %67 = memref.load %arg2[%c67] : memref<98xf32, #tpu.memory_space<smem>>
    %c68 = arith.constant 68 : index
    %68 = memref.load %arg2[%c68] : memref<98xf32, #tpu.memory_space<smem>>
    %c69 = arith.constant 69 : index
    %69 = memref.load %arg2[%c69] : memref<98xf32, #tpu.memory_space<smem>>
    %c70 = arith.constant 70 : index
    %70 = memref.load %arg2[%c70] : memref<98xf32, #tpu.memory_space<smem>>
    %c71 = arith.constant 71 : index
    %71 = memref.load %arg2[%c71] : memref<98xf32, #tpu.memory_space<smem>>
    %c72 = arith.constant 72 : index
    %72 = memref.load %arg2[%c72] : memref<98xf32, #tpu.memory_space<smem>>
    %c73 = arith.constant 73 : index
    %73 = memref.load %arg2[%c73] : memref<98xf32, #tpu.memory_space<smem>>
    %c74 = arith.constant 74 : index
    %74 = memref.load %arg2[%c74] : memref<98xf32, #tpu.memory_space<smem>>
    %c75 = arith.constant 75 : index
    %75 = memref.load %arg2[%c75] : memref<98xf32, #tpu.memory_space<smem>>
    %c76 = arith.constant 76 : index
    %76 = memref.load %arg2[%c76] : memref<98xf32, #tpu.memory_space<smem>>
    %c77 = arith.constant 77 : index
    %77 = memref.load %arg2[%c77] : memref<98xf32, #tpu.memory_space<smem>>
    %c78 = arith.constant 78 : index
    %78 = memref.load %arg2[%c78] : memref<98xf32, #tpu.memory_space<smem>>
    %c79 = arith.constant 79 : index
    %79 = memref.load %arg2[%c79] : memref<98xf32, #tpu.memory_space<smem>>
    %c80 = arith.constant 80 : index
    %80 = memref.load %arg2[%c80] : memref<98xf32, #tpu.memory_space<smem>>
    %c81 = arith.constant 81 : index
    %81 = memref.load %arg2[%c81] : memref<98xf32, #tpu.memory_space<smem>>
    %c82 = arith.constant 82 : index
    %82 = memref.load %arg2[%c82] : memref<98xf32, #tpu.memory_space<smem>>
    %c83 = arith.constant 83 : index
    %83 = memref.load %arg2[%c83] : memref<98xf32, #tpu.memory_space<smem>>
    %c84 = arith.constant 84 : index
    %84 = memref.load %arg2[%c84] : memref<98xf32, #tpu.memory_space<smem>>
    %c85 = arith.constant 85 : index
    %85 = memref.load %arg2[%c85] : memref<98xf32, #tpu.memory_space<smem>>
    %c86 = arith.constant 86 : index
    %86 = memref.load %arg2[%c86] : memref<98xf32, #tpu.memory_space<smem>>
    %c87 = arith.constant 87 : index
    %87 = memref.load %arg2[%c87] : memref<98xf32, #tpu.memory_space<smem>>
    %c88 = arith.constant 88 : index
    %88 = memref.load %arg2[%c88] : memref<98xf32, #tpu.memory_space<smem>>
    %c89 = arith.constant 89 : index
    %89 = memref.load %arg2[%c89] : memref<98xf32, #tpu.memory_space<smem>>
    %c90 = arith.constant 90 : index
    %90 = memref.load %arg2[%c90] : memref<98xf32, #tpu.memory_space<smem>>
    %c91 = arith.constant 91 : index
    %91 = memref.load %arg2[%c91] : memref<98xf32, #tpu.memory_space<smem>>
    %c92 = arith.constant 92 : index
    %92 = memref.load %arg2[%c92] : memref<98xf32, #tpu.memory_space<smem>>
    %c93 = arith.constant 93 : index
    %93 = memref.load %arg2[%c93] : memref<98xf32, #tpu.memory_space<smem>>
    %c94 = arith.constant 94 : index
    %94 = memref.load %arg2[%c94] : memref<98xf32, #tpu.memory_space<smem>>
    %c95 = arith.constant 95 : index
    %95 = memref.load %arg2[%c95] : memref<98xf32, #tpu.memory_space<smem>>
    %c96 = arith.constant 96 : index
    %96 = memref.load %arg2[%c96] : memref<98xf32, #tpu.memory_space<smem>>
    %c97 = arith.constant 97 : index
    %97 = memref.load %arg2[%c97] : memref<98xf32, #tpu.memory_space<smem>>
    %c0_0 = arith.constant 0 : index
    %98 = memref.load %arg3[%c0_0] : memref<1xf32, #tpu.memory_space<smem>>
    %99 = tpu.iota {dimensions = array<i32: 1>} : vector<1x256xi32>
    %c15_i32 = arith.constant 15 : i32
    %100 = vector.broadcast %c15_i32 : i32 to vector<1x256xi32>
    %101 = arith.andi %99, %100 : vector<1x256xi32>
    %c-3_i32 = arith.constant -3 : i32
    %102 = vector.broadcast %c-3_i32 : i32 to vector<1x256xi32>
    %103 = arith.addi %101, %102 : vector<1x256xi32>
    %c0_i32 = arith.constant 0 : i32
    %104 = vector.broadcast %c0_i32 : i32 to vector<1x256xi32>
    %105 = arith.cmpi sge, %103, %104 : vector<1x256xi32>
    %c-3_i32_1 = arith.constant -3 : i32
    %106 = vector.broadcast %c-3_i32_1 : i32 to vector<1x256xi32>
    %107 = arith.addi %101, %106 : vector<1x256xi32>
    %c16_i32 = arith.constant 16 : i32
    %108 = vector.broadcast %c16_i32 : i32 to vector<1x256xi32>
    %109 = arith.cmpi slt, %107, %108 : vector<1x256xi32>
    %110 = arith.andi %105, %109 : vector<1x256xi1>
    %c-2_i32 = arith.constant -2 : i32
    %111 = vector.broadcast %c-2_i32 : i32 to vector<1x256xi32>
    %112 = arith.addi %101, %111 : vector<1x256xi32>
    %c0_i32_2 = arith.constant 0 : i32
    %113 = vector.broadcast %c0_i32_2 : i32 to vector<1x256xi32>
    %114 = arith.cmpi sge, %112, %113 : vector<1x256xi32>
    %c-2_i32_3 = arith.constant -2 : i32
    %115 = vector.broadcast %c-2_i32_3 : i32 to vector<1x256xi32>
    %116 = arith.addi %101, %115 : vector<1x256xi32>
    %c16_i32_4 = arith.constant 16 : i32
    %117 = vector.broadcast %c16_i32_4 : i32 to vector<1x256xi32>
    %118 = arith.cmpi slt, %116, %117 : vector<1x256xi32>
    %119 = arith.andi %114, %118 : vector<1x256xi1>
    %c-1_i32 = arith.constant -1 : i32
    %120 = vector.broadcast %c-1_i32 : i32 to vector<1x256xi32>
    %121 = arith.addi %101, %120 : vector<1x256xi32>
    %c0_i32_5 = arith.constant 0 : i32
    %122 = vector.broadcast %c0_i32_5 : i32 to vector<1x256xi32>
    %123 = arith.cmpi sge, %121, %122 : vector<1x256xi32>
    %c-1_i32_6 = arith.constant -1 : i32
    %124 = vector.broadcast %c-1_i32_6 : i32 to vector<1x256xi32>
    %125 = arith.addi %101, %124 : vector<1x256xi32>
    %c16_i32_7 = arith.constant 16 : i32
    %126 = vector.broadcast %c16_i32_7 : i32 to vector<1x256xi32>
    %127 = arith.cmpi slt, %125, %126 : vector<1x256xi32>
    %128 = arith.andi %123, %127 : vector<1x256xi1>
    %c0_i32_8 = arith.constant 0 : i32
    %129 = vector.broadcast %c0_i32_8 : i32 to vector<1x256xi32>
    %130 = arith.addi %101, %129 : vector<1x256xi32>
    %c0_i32_9 = arith.constant 0 : i32
    %131 = vector.broadcast %c0_i32_9 : i32 to vector<1x256xi32>
    %132 = arith.cmpi sge, %130, %131 : vector<1x256xi32>
    %c0_i32_10 = arith.constant 0 : i32
    %133 = vector.broadcast %c0_i32_10 : i32 to vector<1x256xi32>
    %134 = arith.addi %101, %133 : vector<1x256xi32>
    %c16_i32_11 = arith.constant 16 : i32
    %135 = vector.broadcast %c16_i32_11 : i32 to vector<1x256xi32>
    %136 = arith.cmpi slt, %134, %135 : vector<1x256xi32>
    %137 = arith.andi %132, %136 : vector<1x256xi1>
    %c1_i32 = arith.constant 1 : i32
    %138 = vector.broadcast %c1_i32 : i32 to vector<1x256xi32>
    %139 = arith.addi %101, %138 : vector<1x256xi32>
    %c0_i32_12 = arith.constant 0 : i32
    %140 = vector.broadcast %c0_i32_12 : i32 to vector<1x256xi32>
    %141 = arith.cmpi sge, %139, %140 : vector<1x256xi32>
    %c1_i32_13 = arith.constant 1 : i32
    %142 = vector.broadcast %c1_i32_13 : i32 to vector<1x256xi32>
    %143 = arith.addi %101, %142 : vector<1x256xi32>
    %c16_i32_14 = arith.constant 16 : i32
    %144 = vector.broadcast %c16_i32_14 : i32 to vector<1x256xi32>
    %145 = arith.cmpi slt, %143, %144 : vector<1x256xi32>
    %146 = arith.andi %141, %145 : vector<1x256xi1>
    %c2_i32 = arith.constant 2 : i32
    %147 = vector.broadcast %c2_i32 : i32 to vector<1x256xi32>
    %148 = arith.addi %101, %147 : vector<1x256xi32>
    %c0_i32_15 = arith.constant 0 : i32
    %149 = vector.broadcast %c0_i32_15 : i32 to vector<1x256xi32>
    %150 = arith.cmpi sge, %148, %149 : vector<1x256xi32>
    %c2_i32_16 = arith.constant 2 : i32
    %151 = vector.broadcast %c2_i32_16 : i32 to vector<1x256xi32>
    %152 = arith.addi %101, %151 : vector<1x256xi32>
    %c16_i32_17 = arith.constant 16 : i32
    %153 = vector.broadcast %c16_i32_17 : i32 to vector<1x256xi32>
    %154 = arith.cmpi slt, %152, %153 : vector<1x256xi32>
    %155 = arith.andi %150, %154 : vector<1x256xi1>
    %c3_i32 = arith.constant 3 : i32
    %156 = vector.broadcast %c3_i32 : i32 to vector<1x256xi32>
    %157 = arith.addi %101, %156 : vector<1x256xi32>
    %c0_i32_18 = arith.constant 0 : i32
    %158 = vector.broadcast %c0_i32_18 : i32 to vector<1x256xi32>
    %159 = arith.cmpi sge, %157, %158 : vector<1x256xi32>
    %c3_i32_19 = arith.constant 3 : i32
    %160 = vector.broadcast %c3_i32_19 : i32 to vector<1x256xi32>
    %161 = arith.addi %101, %160 : vector<1x256xi32>
    %c16_i32_20 = arith.constant 16 : i32
    %162 = vector.broadcast %c16_i32_20 : i32 to vector<1x256xi32>
    %163 = arith.cmpi slt, %161, %162 : vector<1x256xi32>
    %164 = arith.andi %159, %163 : vector<1x256xi1>
    %cst = arith.constant 0.000000e+00 : f32
    %165 = vector.broadcast %cst : f32 to vector<2x1x51xf32>
    %c0_21 = arith.constant 0 : index
    %c0_22 = arith.constant 0 : index
    %c0_23 = arith.constant 0 : index
    %166 = vector.load %arg5[%c0_21, %c0_22, %c0_23] : memref<2x1x358xf32, #tpu.memory_space<vmem>>, vector<2x1x51xf32>
    tpu.vector_store %arg5[%c0_21, %c0_22, %c0_23], %165 {strides = array<i32>} : memref<2x1x358xf32, #tpu.memory_space<vmem>>, vector<2x1x51xf32>,
    %cst_24 = arith.constant 0.000000e+00 : f32
    %167 = vector.broadcast %cst_24 : f32 to vector<2x1x51xf32>
    %c0_25 = arith.constant 0 : index
    %c0_26 = arith.constant 0 : index
    %c307 = arith.constant 307 : index
    %168 = vector.load %arg5[%c0_25, %c0_26, %c307] : memref<2x1x358xf32, #tpu.memory_space<vmem>>, vector<2x1x51xf32>
    tpu.vector_store %arg5[%c0_25, %c0_26, %c307], %167 {strides = array<i32>} : memref<2x1x358xf32, #tpu.memory_space<vmem>>, vector<2x1x51xf32>,
    %c0_27 = arith.constant 0 : index
    %c0_28 = arith.constant 0 : index
    %c0_29 = arith.constant 0 : index
    %169 = vector.load %arg1[%c0_27, %c0_28, %c0_29] : memref<1x4x256xf32, #tpu.memory_space<vmem>>, vector<1x4x256xf32>
    %cst_30 = arith.constant dense<0.000000e+00> : vector<1x256xf32>
    %170 = vector.multi_reduction <add>, %169, %cst_30 [1] : vector<1x4x256xf32> to vector<1x256xf32>
    %cst_31 = arith.constant 4.000000e+00 : f32
    %171 = vector.broadcast %cst_31 : f32 to vector<1x256xf32>
    %172 = arith.divf %170, %171 : vector<1x256xf32>
    %c0_32 = arith.constant 0 : index
    %c0_33 = arith.constant 0 : index
    %c51_34 = arith.constant 51 : index
    %173 = vector.load %arg5[%c0_32, %c0_33, %c51_34] : memref<2x1x358xf32, #tpu.memory_space<vmem>>, vector<1x1x256xf32>
    %174 = vector.shape_cast %173 : vector<1x1x256xf32> to vector<1x256xf32>
    %175 = vector.shape_cast %172 : vector<1x256xf32> to vector<1x1x256xf32>
    tpu.vector_store %arg5[%c0_32, %c0_33, %c51_34], %175 {strides = array<i32>} : memref<2x1x358xf32, #tpu.memory_space<vmem>>, vector<1x1x256xf32>,
    %cst_35 = arith.constant dense<0xFF800000> : vector<1x256xf32>
    %176 = vector.multi_reduction <maximumf>, %169, %cst_35 [1] : vector<1x4x256xf32> to vector<1x256xf32>
    %c1_36 = arith.constant 1 : index
    %c0_37 = arith.constant 0 : index
    %c51_38 = arith.constant 51 : index
    %177 = vector.load %arg5[%c1_36, %c0_37, %c51_38] : memref<2x1x358xf32, #tpu.memory_space<vmem>>, vector<1x1x256xf32>
    %178 = vector.shape_cast %177 : vector<1x1x256xf32> to vector<1x256xf32>
    %179 = vector.shape_cast %176 : vector<1x256xf32> to vector<1x1x256xf32>
    tpu.vector_store %arg5[%c1_36, %c0_37, %c51_38], %179 {strides = array<i32>} : memref<2x1x358xf32, #tpu.memory_space<vmem>>, vector<1x1x256xf32>,
    %c0_39 = arith.constant 0 : index
    %c0_40 = arith.constant 0 : index
    %c0_41 = arith.constant 0 : index
    %180 = vector.load %arg5[%c0_39, %c0_40, %c0_41] : memref<2x1x358xf32, #tpu.memory_space<vmem>>, vector<1x1x358xf32>
    %181 = vector.shape_cast %180 : vector<1x1x358xf32> to vector<1x358xf32>
    %c1_42 = arith.constant 1 : index
    %c0_43 = arith.constant 0 : index
    %c0_44 = arith.constant 0 : index
    %182 = vector.load %arg5[%c1_42, %c0_43, %c0_44] : memref<2x1x358xf32, #tpu.memory_space<vmem>>, vector<1x1x358xf32>
    %183 = vector.shape_cast %182 : vector<1x1x358xf32> to vector<1x358xf32>
    %184 = vector.extract_strided_slice %181 {offsets = [0, 0], sizes = [1, 256], strides = [1, 1]} : vector<1x358xf32> to vector<1x256xf32>
    %185 = vector.broadcast %0 : f32 to vector<1x256xf32>
    %186 = arith.mulf %185, %184 : vector<1x256xf32>
    %187 = vector.extract_strided_slice %181 {offsets = [0, 16], sizes = [1, 256], strides = [1, 1]} : vector<1x358xf32> to vector<1x256xf32>
    %188 = vector.broadcast %7 : f32 to vector<1x256xf32>
    %189 = arith.mulf %188, %187 : vector<1x256xf32>
    %190 = arith.addf %186, %189 : vector<1x256xf32>
    %191 = vector.extract_strided_slice %181 {offsets = [0, 32], sizes = [1, 256], strides = [1, 1]} : vector<1x358xf32> to vector<1x256xf32>
    %192 = vector.broadcast %14 : f32 to vector<1x256xf32>
    %193 = arith.mulf %192, %191 : vector<1x256xf32>
    %194 = arith.addf %190, %193 : vector<1x256xf32>
    %195 = vector.extract_strided_slice %181 {offsets = [0, 48], sizes = [1, 256], strides = [1, 1]} : vector<1x358xf32> to vector<1x256xf32>
    %196 = vector.broadcast %21 : f32 to vector<1x256xf32>
    %197 = arith.mulf %196, %195 : vector<1x256xf32>
    %198 = arith.addf %194, %197 : vector<1x256xf32>
    %199 = vector.extract_strided_slice %181 {offsets = [0, 64], sizes = [1, 256], strides = [1, 1]} : vector<1x358xf32> to vector<1x256xf32>
    %200 = vector.broadcast %28 : f32 to vector<1x256xf32>
    %201 = arith.mulf %200, %199 : vector<1x256xf32>
    %202 = arith.addf %198, %201 : vector<1x256xf32>
    %203 = vector.extract_strided_slice %181 {offsets = [0, 80], sizes = [1, 256], strides = [1, 1]} : vector<1x358xf32> to vector<1x256xf32>
    %204 = vector.broadcast %35 : f32 to vector<1x256xf32>
    %205 = arith.mulf %204, %203 : vector<1x256xf32>
    %206 = arith.addf %202, %205 : vector<1x256xf32>
    %207 = vector.extract_strided_slice %181 {offsets = [0, 96], sizes = [1, 256], strides = [1, 1]} : vector<1x358xf32> to vector<1x256xf32>
    %208 = vector.broadcast %42 : f32 to vector<1x256xf32>
    %209 = arith.mulf %208, %207 : vector<1x256xf32>
    %210 = arith.addf %206, %209 : vector<1x256xf32>
    %211 = vector.extract_strided_slice %183 {offsets = [0, 0], sizes = [1, 256], strides = [1, 1]} : vector<1x358xf32> to vector<1x256xf32>
    %212 = vector.broadcast %49 : f32 to vector<1x256xf32>
    %213 = arith.mulf %212, %211 : vector<1x256xf32>
    %214 = arith.addf %210, %213 : vector<1x256xf32>
    %215 = vector.extract_strided_slice %183 {offsets = [0, 16], sizes = [1, 256], strides = [1, 1]} : vector<1x358xf32> to vector<1x256xf32>
    %216 = vector.broadcast %56 : f32 to vector<1x256xf32>
    %217 = arith.mulf %216, %215 : vector<1x256xf32>
    %218 = arith.addf %214, %217 : vector<1x256xf32>
    %219 = vector.extract_strided_slice %183 {offsets = [0, 32], sizes = [1, 256], strides = [1, 1]} : vector<1x358xf32> to vector<1x256xf32>
    %220 = vector.broadcast %63 : f32 to vector<1x256xf32>
    %221 = arith.mulf %220, %219 : vector<1x256xf32>
    %222 = arith.addf %218, %221 : vector<1x256xf32>
    %223 = vector.extract_strided_slice %183 {offsets = [0, 48], sizes = [1, 256], strides = [1, 1]} : vector<1x358xf32> to vector<1x256xf32>
    %224 = vector.broadcast %70 : f32 to vector<1x256xf32>
    %225 = arith.mulf %224, %223 : vector<1x256xf32>
    %226 = arith.addf %222, %225 : vector<1x256xf32>
    %227 = vector.extract_strided_slice %183 {offsets = [0, 64], sizes = [1, 256], strides = [1, 1]} : vector<1x358xf32> to vector<1x256xf32>
    %228 = vector.broadcast %77 : f32 to vector<1x256xf32>
    %229 = arith.mulf %228, %227 : vector<1x256xf32>
    %230 = arith.addf %226, %229 : vector<1x256xf32>
    %231 = vector.extract_strided_slice %183 {offsets = [0, 80], sizes = [1, 256], strides = [1, 1]} : vector<1x358xf32> to vector<1x256xf32>
    %232 = vector.broadcast %84 : f32 to vector<1x256xf32>
    %233 = arith.mulf %232, %231 : vector<1x256xf32>
    %234 = arith.addf %230, %233 : vector<1x256xf32>
    %235 = vector.extract_strided_slice %183 {offsets = [0, 96], sizes = [1, 256], strides = [1, 1]} : vector<1x358xf32> to vector<1x256xf32>
    %236 = vector.broadcast %91 : f32 to vector<1x256xf32>
    %237 = arith.mulf %236, %235 : vector<1x256xf32>
    %238 = arith.addf %234, %237 : vector<1x256xf32>
    %239 = vector.extract_strided_slice %181 {offsets = [0, 1], sizes = [1, 256], strides = [1, 1]} : vector<1x358xf32> to vector<1x256xf32>
    %240 = vector.broadcast %1 : f32 to vector<1x256xf32>
    %241 = arith.mulf %240, %239 : vector<1x256xf32>
    %242 = vector.extract_strided_slice %181 {offsets = [0, 17], sizes = [1, 256], strides = [1, 1]} : vector<1x358xf32> to vector<1x256xf32>
    %243 = vector.broadcast %8 : f32 to vector<1x256xf32>
    %244 = arith.mulf %243, %242 : vector<1x256xf32>
    %245 = arith.addf %241, %244 : vector<1x256xf32>
    %246 = vector.extract_strided_slice %181 {offsets = [0, 33], sizes = [1, 256], strides = [1, 1]} : vector<1x358xf32> to vector<1x256xf32>
    %247 = vector.broadcast %15 : f32 to vector<1x256xf32>
    %248 = arith.mulf %247, %246 : vector<1x256xf32>
    %249 = arith.addf %245, %248 : vector<1x256xf32>
    %250 = vector.extract_strided_slice %181 {offsets = [0, 49], sizes = [1, 256], strides = [1, 1]} : vector<1x358xf32> to vector<1x256xf32>
    %251 = vector.broadcast %22 : f32 to vector<1x256xf32>
    %252 = arith.mulf %251, %250 : vector<1x256xf32>
    %253 = arith.addf %249, %252 : vector<1x256xf32>
    %254 = vector.extract_strided_slice %181 {offsets = [0, 65], sizes = [1, 256], strides = [1, 1]} : vector<1x358xf32> to vector<1x256xf32>
    %255 = vector.broadcast %29 : f32 to vector<1x256xf32>
    %256 = arith.mulf %255, %254 : vector<1x256xf32>
    %257 = arith.addf %253, %256 : vector<1x256xf32>
    %258 = vector.extract_strided_slice %181 {offsets = [0, 81], sizes = [1, 256], strides = [1, 1]} : vector<1x358xf32> to vector<1x256xf32>
    %259 = vector.broadcast %36 : f32 to vector<1x256xf32>
    %260 = arith.mulf %259, %258 : vector<1x256xf32>
    %261 = arith.addf %257, %260 : vector<1x256xf32>
    %262 = vector.extract_strided_slice %181 {offsets = [0, 97], sizes = [1, 256], strides = [1, 1]} : vector<1x358xf32> to vector<1x256xf32>
    %263 = vector.broadcast %43 : f32 to vector<1x256xf32>
    %264 = arith.mulf %263, %262 : vector<1x256xf32>
    %265 = arith.addf %261, %264 : vector<1x256xf32>
    %266 = vector.extract_strided_slice %183 {offsets = [0, 1], sizes = [1, 256], strides = [1, 1]} : vector<1x358xf32> to vector<1x256xf32>
    %267 = vector.broadcast %50 : f32 to vector<1x256xf32>
    %268 = arith.mulf %267, %266 : vector<1x256xf32>
    %269 = arith.addf %265, %268 : vector<1x256xf32>
    %270 = vector.extract_strided_slice %183 {offsets = [0, 17], sizes = [1, 256], strides = [1, 1]} : vector<1x358xf32> to vector<1x256xf32>
    %271 = vector.broadcast %57 : f32 to vector<1x256xf32>
    %272 = arith.mulf %271, %270 : vector<1x256xf32>
    %273 = arith.addf %269, %272 : vector<1x256xf32>
    %274 = vector.extract_strided_slice %183 {offsets = [0, 33], sizes = [1, 256], strides = [1, 1]} : vector<1x358xf32> to vector<1x256xf32>
    %275 = vector.broadcast %64 : f32 to vector<1x256xf32>
    %276 = arith.mulf %275, %274 : vector<1x256xf32>
    %277 = arith.addf %273, %276 : vector<1x256xf32>
    %278 = vector.extract_strided_slice %183 {offsets = [0, 49], sizes = [1, 256], strides = [1, 1]} : vector<1x358xf32> to vector<1x256xf32>
    %279 = vector.broadcast %71 : f32 to vector<1x256xf32>
    %280 = arith.mulf %279, %278 : vector<1x256xf32>
    %281 = arith.addf %277, %280 : vector<1x256xf32>
    %282 = vector.extract_strided_slice %183 {offsets = [0, 65], sizes = [1, 256], strides = [1, 1]} : vector<1x358xf32> to vector<1x256xf32>
    %283 = vector.broadcast %78 : f32 to vector<1x256xf32>
    %284 = arith.mulf %283, %282 : vector<1x256xf32>
    %285 = arith.addf %281, %284 : vector<1x256xf32>
    %286 = vector.extract_strided_slice %183 {offsets = [0, 81], sizes = [1, 256], strides = [1, 1]} : vector<1x358xf32> to vector<1x256xf32>
    %287 = vector.broadcast %85 : f32 to vector<1x256xf32>
    %288 = arith.mulf %287, %286 : vector<1x256xf32>
    %289 = arith.addf %285, %288 : vector<1x256xf32>
    %290 = vector.extract_strided_slice %183 {offsets = [0, 97], sizes = [1, 256], strides = [1, 1]} : vector<1x358xf32> to vector<1x256xf32>
    %291 = vector.broadcast %92 : f32 to vector<1x256xf32>
    %292 = arith.mulf %291, %290 : vector<1x256xf32>
    %293 = arith.addf %289, %292 : vector<1x256xf32>
    %294 = vector.extract_strided_slice %181 {offsets = [0, 2], sizes = [1, 256], strides = [1, 1]} : vector<1x358xf32> to vector<1x256xf32>
    %295 = vector.broadcast %2 : f32 to vector<1x256xf32>
    %296 = arith.mulf %295, %294 : vector<1x256xf32>
    %297 = vector.extract_strided_slice %181 {offsets = [0, 18], sizes = [1, 256], strides = [1, 1]} : vector<1x358xf32> to vector<1x256xf32>
    %298 = vector.broadcast %9 : f32 to vector<1x256xf32>
    %299 = arith.mulf %298, %297 : vector<1x256xf32>
    %300 = arith.addf %296, %299 : vector<1x256xf32>
    %301 = vector.extract_strided_slice %181 {offsets = [0, 34], sizes = [1, 256], strides = [1, 1]} : vector<1x358xf32> to vector<1x256xf32>
    %302 = vector.broadcast %16 : f32 to vector<1x256xf32>
    %303 = arith.mulf %302, %301 : vector<1x256xf32>
    %304 = arith.addf %300, %303 : vector<1x256xf32>
    %305 = vector.extract_strided_slice %181 {offsets = [0, 50], sizes = [1, 256], strides = [1, 1]} : vector<1x358xf32> to vector<1x256xf32>
    %306 = vector.broadcast %23 : f32 to vector<1x256xf32>
    %307 = arith.mulf %306, %305 : vector<1x256xf32>
    %308 = arith.addf %304, %307 : vector<1x256xf32>
    %309 = vector.extract_strided_slice %181 {offsets = [0, 66], sizes = [1, 256], strides = [1, 1]} : vector<1x358xf32> to vector<1x256xf32>
    %310 = vector.broadcast %30 : f32 to vector<1x256xf32>
    %311 = arith.mulf %310, %309 : vector<1x256xf32>
    %312 = arith.addf %308, %311 : vector<1x256xf32>
    %313 = vector.extract_strided_slice %181 {offsets = [0, 82], sizes = [1, 256], strides = [1, 1]} : vector<1x358xf32> to vector<1x256xf32>
    %314 = vector.broadcast %37 : f32 to vector<1x256xf32>
    %315 = arith.mulf %314, %313 : vector<1x256xf32>
    %316 = arith.addf %312, %315 : vector<1x256xf32>
    %317 = vector.extract_strided_slice %181 {offsets = [0, 98], sizes = [1, 256], strides = [1, 1]} : vector<1x358xf32> to vector<1x256xf32>
    %318 = vector.broadcast %44 : f32 to vector<1x256xf32>
    %319 = arith.mulf %318, %317 : vector<1x256xf32>
    %320 = arith.addf %316, %319 : vector<1x256xf32>
    %321 = vector.extract_strided_slice %183 {offsets = [0, 2], sizes = [1, 256], strides = [1, 1]} : vector<1x358xf32> to vector<1x256xf32>
    %322 = vector.broadcast %51 : f32 to vector<1x256xf32>
    %323 = arith.mulf %322, %321 : vector<1x256xf32>
    %324 = arith.addf %320, %323 : vector<1x256xf32>
    %325 = vector.extract_strided_slice %183 {offsets = [0, 18], sizes = [1, 256], strides = [1, 1]} : vector<1x358xf32> to vector<1x256xf32>
    %326 = vector.broadcast %58 : f32 to vector<1x256xf32>
    %327 = arith.mulf %326, %325 : vector<1x256xf32>
    %328 = arith.addf %324, %327 : vector<1x256xf32>
    %329 = vector.extract_strided_slice %183 {offsets = [0, 34], sizes = [1, 256], strides = [1, 1]} : vector<1x358xf32> to vector<1x256xf32>
    %330 = vector.broadcast %65 : f32 to vector<1x256xf32>
    %331 = arith.mulf %330, %329 : vector<1x256xf32>
    %332 = arith.addf %328, %331 : vector<1x256xf32>
    %333 = vector.extract_strided_slice %183 {offsets = [0, 50], sizes = [1, 256], strides = [1, 1]} : vector<1x358xf32> to vector<1x256xf32>
    %334 = vector.broadcast %72 : f32 to vector<1x256xf32>
    %335 = arith.mulf %334, %333 : vector<1x256xf32>
    %336 = arith.addf %332, %335 : vector<1x256xf32>
    %337 = vector.extract_strided_slice %183 {offsets = [0, 66], sizes = [1, 256], strides = [1, 1]} : vector<1x358xf32> to vector<1x256xf32>
    %338 = vector.broadcast %79 : f32 to vector<1x256xf32>
    %339 = arith.mulf %338, %337 : vector<1x256xf32>
    %340 = arith.addf %336, %339 : vector<1x256xf32>
    %341 = vector.extract_strided_slice %183 {offsets = [0, 82], sizes = [1, 256], strides = [1, 1]} : vector<1x358xf32> to vector<1x256xf32>
    %342 = vector.broadcast %86 : f32 to vector<1x256xf32>
    %343 = arith.mulf %342, %341 : vector<1x256xf32>
    %344 = arith.addf %340, %343 : vector<1x256xf32>
    %345 = vector.extract_strided_slice %183 {offsets = [0, 98], sizes = [1, 256], strides = [1, 1]} : vector<1x358xf32> to vector<1x256xf32>
    %346 = vector.broadcast %93 : f32 to vector<1x256xf32>
    %347 = arith.mulf %346, %345 : vector<1x256xf32>
    %348 = arith.addf %344, %347 : vector<1x256xf32>
    %349 = vector.extract_strided_slice %181 {offsets = [0, 3], sizes = [1, 256], strides = [1, 1]} : vector<1x358xf32> to vector<1x256xf32>
    %350 = vector.broadcast %3 : f32 to vector<1x256xf32>
    %351 = arith.mulf %350, %349 : vector<1x256xf32>
    %352 = vector.extract_strided_slice %181 {offsets = [0, 19], sizes = [1, 256], strides = [1, 1]} : vector<1x358xf32> to vector<1x256xf32>
    %353 = vector.broadcast %10 : f32 to vector<1x256xf32>
    %354 = arith.mulf %353, %352 : vector<1x256xf32>
    %355 = arith.addf %351, %354 : vector<1x256xf32>
    %356 = vector.extract_strided_slice %181 {offsets = [0, 35], sizes = [1, 256], strides = [1, 1]} : vector<1x358xf32> to vector<1x256xf32>
    %357 = vector.broadcast %17 : f32 to vector<1x256xf32>
    %358 = arith.mulf %357, %356 : vector<1x256xf32>
    %359 = arith.addf %355, %358 : vector<1x256xf32>
    %360 = vector.extract_strided_slice %181 {offsets = [0, 51], sizes = [1, 256], strides = [1, 1]} : vector<1x358xf32> to vector<1x256xf32>
    %361 = vector.broadcast %24 : f32 to vector<1x256xf32>
    %362 = arith.mulf %361, %360 : vector<1x256xf32>
    %363 = arith.addf %359, %362 : vector<1x256xf32>
    %364 = vector.extract_strided_slice %181 {offsets = [0, 67], sizes = [1, 256], strides = [1, 1]} : vector<1x358xf32> to vector<1x256xf32>
    %365 = vector.broadcast %31 : f32 to vector<1x256xf32>
    %366 = arith.mulf %365, %364 : vector<1x256xf32>
    %367 = arith.addf %363, %366 : vector<1x256xf32>
    %368 = vector.extract_strided_slice %181 {offsets = [0, 83], sizes = [1, 256], strides = [1, 1]} : vector<1x358xf32> to vector<1x256xf32>
    %369 = vector.broadcast %38 : f32 to vector<1x256xf32>
    %370 = arith.mulf %369, %368 : vector<1x256xf32>
    %371 = arith.addf %367, %370 : vector<1x256xf32>
    %372 = vector.extract_strided_slice %181 {offsets = [0, 99], sizes = [1, 256], strides = [1, 1]} : vector<1x358xf32> to vector<1x256xf32>
    %373 = vector.broadcast %45 : f32 to vector<1x256xf32>
    %374 = arith.mulf %373, %372 : vector<1x256xf32>
    %375 = arith.addf %371, %374 : vector<1x256xf32>
    %376 = vector.extract_strided_slice %183 {offsets = [0, 3], sizes = [1, 256], strides = [1, 1]} : vector<1x358xf32> to vector<1x256xf32>
    %377 = vector.broadcast %52 : f32 to vector<1x256xf32>
    %378 = arith.mulf %377, %376 : vector<1x256xf32>
    %379 = arith.addf %375, %378 : vector<1x256xf32>
    %380 = vector.extract_strided_slice %183 {offsets = [0, 19], sizes = [1, 256], strides = [1, 1]} : vector<1x358xf32> to vector<1x256xf32>
    %381 = vector.broadcast %59 : f32 to vector<1x256xf32>
    %382 = arith.mulf %381, %380 : vector<1x256xf32>
    %383 = arith.addf %379, %382 : vector<1x256xf32>
    %384 = vector.extract_strided_slice %183 {offsets = [0, 35], sizes = [1, 256], strides = [1, 1]} : vector<1x358xf32> to vector<1x256xf32>
    %385 = vector.broadcast %66 : f32 to vector<1x256xf32>
    %386 = arith.mulf %385, %384 : vector<1x256xf32>
    %387 = arith.addf %383, %386 : vector<1x256xf32>
    %388 = vector.extract_strided_slice %183 {offsets = [0, 51], sizes = [1, 256], strides = [1, 1]} : vector<1x358xf32> to vector<1x256xf32>
    %389 = vector.broadcast %73 : f32 to vector<1x256xf32>
    %390 = arith.mulf %389, %388 : vector<1x256xf32>
    %391 = arith.addf %387, %390 : vector<1x256xf32>
    %392 = vector.extract_strided_slice %183 {offsets = [0, 67], sizes = [1, 256], strides = [1, 1]} : vector<1x358xf32> to vector<1x256xf32>
    %393 = vector.broadcast %80 : f32 to vector<1x256xf32>
    %394 = arith.mulf %393, %392 : vector<1x256xf32>
    %395 = arith.addf %391, %394 : vector<1x256xf32>
    %396 = vector.extract_strided_slice %183 {offsets = [0, 83], sizes = [1, 256], strides = [1, 1]} : vector<1x358xf32> to vector<1x256xf32>
    %397 = vector.broadcast %87 : f32 to vector<1x256xf32>
    %398 = arith.mulf %397, %396 : vector<1x256xf32>
    %399 = arith.addf %395, %398 : vector<1x256xf32>
    %400 = vector.extract_strided_slice %183 {offsets = [0, 99], sizes = [1, 256], strides = [1, 1]} : vector<1x358xf32> to vector<1x256xf32>
    %401 = vector.broadcast %94 : f32 to vector<1x256xf32>
    %402 = arith.mulf %401, %400 : vector<1x256xf32>
    %403 = arith.addf %399, %402 : vector<1x256xf32>
    %404 = vector.extract_strided_slice %181 {offsets = [0, 4], sizes = [1, 256], strides = [1, 1]} : vector<1x358xf32> to vector<1x256xf32>
    %405 = vector.broadcast %4 : f32 to vector<1x256xf32>
    %406 = arith.mulf %405, %404 : vector<1x256xf32>
    %407 = vector.extract_strided_slice %181 {offsets = [0, 20], sizes = [1, 256], strides = [1, 1]} : vector<1x358xf32> to vector<1x256xf32>
    %408 = vector.broadcast %11 : f32 to vector<1x256xf32>
    %409 = arith.mulf %408, %407 : vector<1x256xf32>
    %410 = arith.addf %406, %409 : vector<1x256xf32>
    %411 = vector.extract_strided_slice %181 {offsets = [0, 36], sizes = [1, 256], strides = [1, 1]} : vector<1x358xf32> to vector<1x256xf32>
    %412 = vector.broadcast %18 : f32 to vector<1x256xf32>
    %413 = arith.mulf %412, %411 : vector<1x256xf32>
    %414 = arith.addf %410, %413 : vector<1x256xf32>
    %415 = vector.extract_strided_slice %181 {offsets = [0, 52], sizes = [1, 256], strides = [1, 1]} : vector<1x358xf32> to vector<1x256xf32>
    %416 = vector.broadcast %25 : f32 to vector<1x256xf32>
    %417 = arith.mulf %416, %415 : vector<1x256xf32>
    %418 = arith.addf %414, %417 : vector<1x256xf32>
    %419 = vector.extract_strided_slice %181 {offsets = [0, 68], sizes = [1, 256], strides = [1, 1]} : vector<1x358xf32> to vector<1x256xf32>
    %420 = vector.broadcast %32 : f32 to vector<1x256xf32>
    %421 = arith.mulf %420, %419 : vector<1x256xf32>
    %422 = arith.addf %418, %421 : vector<1x256xf32>
    %423 = vector.extract_strided_slice %181 {offsets = [0, 84], sizes = [1, 256], strides = [1, 1]} : vector<1x358xf32> to vector<1x256xf32>
    %424 = vector.broadcast %39 : f32 to vector<1x256xf32>
    %425 = arith.mulf %424, %423 : vector<1x256xf32>
    %426 = arith.addf %422, %425 : vector<1x256xf32>
    %427 = vector.extract_strided_slice %181 {offsets = [0, 100], sizes = [1, 256], strides = [1, 1]} : vector<1x358xf32> to vector<1x256xf32>
    %428 = vector.broadcast %46 : f32 to vector<1x256xf32>
    %429 = arith.mulf %428, %427 : vector<1x256xf32>
    %430 = arith.addf %426, %429 : vector<1x256xf32>
    %431 = vector.extract_strided_slice %183 {offsets = [0, 4], sizes = [1, 256], strides = [1, 1]} : vector<1x358xf32> to vector<1x256xf32>
    %432 = vector.broadcast %53 : f32 to vector<1x256xf32>
    %433 = arith.mulf %432, %431 : vector<1x256xf32>
    %434 = arith.addf %430, %433 : vector<1x256xf32>
    %435 = vector.extract_strided_slice %183 {offsets = [0, 20], sizes = [1, 256], strides = [1, 1]} : vector<1x358xf32> to vector<1x256xf32>
    %436 = vector.broadcast %60 : f32 to vector<1x256xf32>
    %437 = arith.mulf %436, %435 : vector<1x256xf32>
    %438 = arith.addf %434, %437 : vector<1x256xf32>
    %439 = vector.extract_strided_slice %183 {offsets = [0, 36], sizes = [1, 256], strides = [1, 1]} : vector<1x358xf32> to vector<1x256xf32>
    %440 = vector.broadcast %67 : f32 to vector<1x256xf32>
    %441 = arith.mulf %440, %439 : vector<1x256xf32>
    %442 = arith.addf %438, %441 : vector<1x256xf32>
    %443 = vector.extract_strided_slice %183 {offsets = [0, 52], sizes = [1, 256], strides = [1, 1]} : vector<1x358xf32> to vector<1x256xf32>
    %444 = vector.broadcast %74 : f32 to vector<1x256xf32>
    %445 = arith.mulf %444, %443 : vector<1x256xf32>
    %446 = arith.addf %442, %445 : vector<1x256xf32>
    %447 = vector.extract_strided_slice %183 {offsets = [0, 68], sizes = [1, 256], strides = [1, 1]} : vector<1x358xf32> to vector<1x256xf32>
    %448 = vector.broadcast %81 : f32 to vector<1x256xf32>
    %449 = arith.mulf %448, %447 : vector<1x256xf32>
    %450 = arith.addf %446, %449 : vector<1x256xf32>
    %451 = vector.extract_strided_slice %183 {offsets = [0, 84], sizes = [1, 256], strides = [1, 1]} : vector<1x358xf32> to vector<1x256xf32>
    %452 = vector.broadcast %88 : f32 to vector<1x256xf32>
    %453 = arith.mulf %452, %451 : vector<1x256xf32>
    %454 = arith.addf %450, %453 : vector<1x256xf32>
    %455 = vector.extract_strided_slice %183 {offsets = [0, 100], sizes = [1, 256], strides = [1, 1]} : vector<1x358xf32> to vector<1x256xf32>
    %456 = vector.broadcast %95 : f32 to vector<1x256xf32>
    %457 = arith.mulf %456, %455 : vector<1x256xf32>
    %458 = arith.addf %454, %457 : vector<1x256xf32>
    %459 = vector.extract_strided_slice %181 {offsets = [0, 5], sizes = [1, 256], strides = [1, 1]} : vector<1x358xf32> to vector<1x256xf32>
    %460 = vector.broadcast %5 : f32 to vector<1x256xf32>
    %461 = arith.mulf %460, %459 : vector<1x256xf32>
    %462 = vector.extract_strided_slice %181 {offsets = [0, 21], sizes = [1, 256], strides = [1, 1]} : vector<1x358xf32> to vector<1x256xf32>
    %463 = vector.broadcast %12 : f32 to vector<1x256xf32>
    %464 = arith.mulf %463, %462 : vector<1x256xf32>
    %465 = arith.addf %461, %464 : vector<1x256xf32>
    %466 = vector.extract_strided_slice %181 {offsets = [0, 37], sizes = [1, 256], strides = [1, 1]} : vector<1x358xf32> to vector<1x256xf32>
    %467 = vector.broadcast %19 : f32 to vector<1x256xf32>
    %468 = arith.mulf %467, %466 : vector<1x256xf32>
    %469 = arith.addf %465, %468 : vector<1x256xf32>
    %470 = vector.extract_strided_slice %181 {offsets = [0, 53], sizes = [1, 256], strides = [1, 1]} : vector<1x358xf32> to vector<1x256xf32>
    %471 = vector.broadcast %26 : f32 to vector<1x256xf32>
    %472 = arith.mulf %471, %470 : vector<1x256xf32>
    %473 = arith.addf %469, %472 : vector<1x256xf32>
    %474 = vector.extract_strided_slice %181 {offsets = [0, 69], sizes = [1, 256], strides = [1, 1]} : vector<1x358xf32> to vector<1x256xf32>
    %475 = vector.broadcast %33 : f32 to vector<1x256xf32>
    %476 = arith.mulf %475, %474 : vector<1x256xf32>
    %477 = arith.addf %473, %476 : vector<1x256xf32>
    %478 = vector.extract_strided_slice %181 {offsets = [0, 85], sizes = [1, 256], strides = [1, 1]} : vector<1x358xf32> to vector<1x256xf32>
    %479 = vector.broadcast %40 : f32 to vector<1x256xf32>
    %480 = arith.mulf %479, %478 : vector<1x256xf32>
    %481 = arith.addf %477, %480 : vector<1x256xf32>
    %482 = vector.extract_strided_slice %181 {offsets = [0, 101], sizes = [1, 256], strides = [1, 1]} : vector<1x358xf32> to vector<1x256xf32>
    %483 = vector.broadcast %47 : f32 to vector<1x256xf32>
    %484 = arith.mulf %483, %482 : vector<1x256xf32>
    %485 = arith.addf %481, %484 : vector<1x256xf32>
    %486 = vector.extract_strided_slice %183 {offsets = [0, 5], sizes = [1, 256], strides = [1, 1]} : vector<1x358xf32> to vector<1x256xf32>
    %487 = vector.broadcast %54 : f32 to vector<1x256xf32>
    %488 = arith.mulf %487, %486 : vector<1x256xf32>
    %489 = arith.addf %485, %488 : vector<1x256xf32>
    %490 = vector.extract_strided_slice %183 {offsets = [0, 21], sizes = [1, 256], strides = [1, 1]} : vector<1x358xf32> to vector<1x256xf32>
    %491 = vector.broadcast %61 : f32 to vector<1x256xf32>
    %492 = arith.mulf %491, %490 : vector<1x256xf32>
    %493 = arith.addf %489, %492 : vector<1x256xf32>
    %494 = vector.extract_strided_slice %183 {offsets = [0, 37], sizes = [1, 256], strides = [1, 1]} : vector<1x358xf32> to vector<1x256xf32>
    %495 = vector.broadcast %68 : f32 to vector<1x256xf32>
    %496 = arith.mulf %495, %494 : vector<1x256xf32>
    %497 = arith.addf %493, %496 : vector<1x256xf32>
    %498 = vector.extract_strided_slice %183 {offsets = [0, 53], sizes = [1, 256], strides = [1, 1]} : vector<1x358xf32> to vector<1x256xf32>
    %499 = vector.broadcast %75 : f32 to vector<1x256xf32>
    %500 = arith.mulf %499, %498 : vector<1x256xf32>
    %501 = arith.addf %497, %500 : vector<1x256xf32>
    %502 = vector.extract_strided_slice %183 {offsets = [0, 69], sizes = [1, 256], strides = [1, 1]} : vector<1x358xf32> to vector<1x256xf32>
    %503 = vector.broadcast %82 : f32 to vector<1x256xf32>
    %504 = arith.mulf %503, %502 : vector<1x256xf32>
    %505 = arith.addf %501, %504 : vector<1x256xf32>
    %506 = vector.extract_strided_slice %183 {offsets = [0, 85], sizes = [1, 256], strides = [1, 1]} : vector<1x358xf32> to vector<1x256xf32>
    %507 = vector.broadcast %89 : f32 to vector<1x256xf32>
    %508 = arith.mulf %507, %506 : vector<1x256xf32>
    %509 = arith.addf %505, %508 : vector<1x256xf32>
    %510 = vector.extract_strided_slice %183 {offsets = [0, 101], sizes = [1, 256], strides = [1, 1]} : vector<1x358xf32> to vector<1x256xf32>
    %511 = vector.broadcast %96 : f32 to vector<1x256xf32>
    %512 = arith.mulf %511, %510 : vector<1x256xf32>
    %513 = arith.addf %509, %512 : vector<1x256xf32>
    %514 = vector.extract_strided_slice %181 {offsets = [0, 6], sizes = [1, 256], strides = [1, 1]} : vector<1x358xf32> to vector<1x256xf32>
    %515 = vector.broadcast %6 : f32 to vector<1x256xf32>
    %516 = arith.mulf %515, %514 : vector<1x256xf32>
    %517 = vector.extract_strided_slice %181 {offsets = [0, 22], sizes = [1, 256], strides = [1, 1]} : vector<1x358xf32> to vector<1x256xf32>
    %518 = vector.broadcast %13 : f32 to vector<1x256xf32>
    %519 = arith.mulf %518, %517 : vector<1x256xf32>
    %520 = arith.addf %516, %519 : vector<1x256xf32>
    %521 = vector.extract_strided_slice %181 {offsets = [0, 38], sizes = [1, 256], strides = [1, 1]} : vector<1x358xf32> to vector<1x256xf32>
    %522 = vector.broadcast %20 : f32 to vector<1x256xf32>
    %523 = arith.mulf %522, %521 : vector<1x256xf32>
    %524 = arith.addf %520, %523 : vector<1x256xf32>
    %525 = vector.extract_strided_slice %181 {offsets = [0, 54], sizes = [1, 256], strides = [1, 1]} : vector<1x358xf32> to vector<1x256xf32>
    %526 = vector.broadcast %27 : f32 to vector<1x256xf32>
    %527 = arith.mulf %526, %525 : vector<1x256xf32>
    %528 = arith.addf %524, %527 : vector<1x256xf32>
    %529 = vector.extract_strided_slice %181 {offsets = [0, 70], sizes = [1, 256], strides = [1, 1]} : vector<1x358xf32> to vector<1x256xf32>
    %530 = vector.broadcast %34 : f32 to vector<1x256xf32>
    %531 = arith.mulf %530, %529 : vector<1x256xf32>
    %532 = arith.addf %528, %531 : vector<1x256xf32>
    %533 = vector.extract_strided_slice %181 {offsets = [0, 86], sizes = [1, 256], strides = [1, 1]} : vector<1x358xf32> to vector<1x256xf32>
    %534 = vector.broadcast %41 : f32 to vector<1x256xf32>
    %535 = arith.mulf %534, %533 : vector<1x256xf32>
    %536 = arith.addf %532, %535 : vector<1x256xf32>
    %537 = vector.extract_strided_slice %181 {offsets = [0, 102], sizes = [1, 256], strides = [1, 1]} : vector<1x358xf32> to vector<1x256xf32>
    %538 = vector.broadcast %48 : f32 to vector<1x256xf32>
    %539 = arith.mulf %538, %537 : vector<1x256xf32>
    %540 = arith.addf %536, %539 : vector<1x256xf32>
    %541 = vector.extract_strided_slice %183 {offsets = [0, 6], sizes = [1, 256], strides = [1, 1]} : vector<1x358xf32> to vector<1x256xf32>
    %542 = vector.broadcast %55 : f32 to vector<1x256xf32>
    %543 = arith.mulf %542, %541 : vector<1x256xf32>
    %544 = arith.addf %540, %543 : vector<1x256xf32>
    %545 = vector.extract_strided_slice %183 {offsets = [0, 22], sizes = [1, 256], strides = [1, 1]} : vector<1x358xf32> to vector<1x256xf32>
    %546 = vector.broadcast %62 : f32 to vector<1x256xf32>
    %547 = arith.mulf %546, %545 : vector<1x256xf32>
    %548 = arith.addf %544, %547 : vector<1x256xf32>
    %549 = vector.extract_strided_slice %183 {offsets = [0, 38], sizes = [1, 256], strides = [1, 1]} : vector<1x358xf32> to vector<1x256xf32>
    %550 = vector.broadcast %69 : f32 to vector<1x256xf32>
    %551 = arith.mulf %550, %549 : vector<1x256xf32>
    %552 = arith.addf %548, %551 : vector<1x256xf32>
    %553 = vector.extract_strided_slice %183 {offsets = [0, 54], sizes = [1, 256], strides = [1, 1]} : vector<1x358xf32> to vector<1x256xf32>
    %554 = vector.broadcast %76 : f32 to vector<1x256xf32>
    %555 = arith.mulf %554, %553 : vector<1x256xf32>
    %556 = arith.addf %552, %555 : vector<1x256xf32>
    %557 = vector.extract_strided_slice %183 {offsets = [0, 70], sizes = [1, 256], strides = [1, 1]} : vector<1x358xf32> to vector<1x256xf32>
    %558 = vector.broadcast %83 : f32 to vector<1x256xf32>
    %559 = arith.mulf %558, %557 : vector<1x256xf32>
    %560 = arith.addf %556, %559 : vector<1x256xf32>
    %561 = vector.extract_strided_slice %183 {offsets = [0, 86], sizes = [1, 256], strides = [1, 1]} : vector<1x358xf32> to vector<1x256xf32>
    %562 = vector.broadcast %90 : f32 to vector<1x256xf32>
    %563 = arith.mulf %562, %561 : vector<1x256xf32>
    %564 = arith.addf %560, %563 : vector<1x256xf32>
    %565 = vector.extract_strided_slice %183 {offsets = [0, 102], sizes = [1, 256], strides = [1, 1]} : vector<1x358xf32> to vector<1x256xf32>
    %566 = vector.broadcast %97 : f32 to vector<1x256xf32>
    %567 = arith.mulf %566, %565 : vector<1x256xf32>
    %568 = arith.addf %564, %567 : vector<1x256xf32>
    %cst_45 = arith.constant 0.000000e+00 : f32
    %569 = vector.broadcast %cst_45 : f32 to vector<1x256xf32>
    %570 = arith.select %110, %238, %569 : vector<1x256xi1>, vector<1x256xf32>
    %cst_46 = arith.constant 0.000000e+00 : f32
    %571 = vector.broadcast %cst_46 : f32 to vector<1x256xf32>
    %572 = arith.select %119, %293, %571 : vector<1x256xi1>, vector<1x256xf32>
    %cst_47 = arith.constant 0.000000e+00 : f32
    %573 = vector.broadcast %cst_47 : f32 to vector<1x256xf32>
    %574 = arith.select %128, %348, %573 : vector<1x256xi1>, vector<1x256xf32>
    %cst_48 = arith.constant 0.000000e+00 : f32
    %575 = vector.broadcast %cst_48 : f32 to vector<1x256xf32>
    %576 = arith.select %137, %403, %575 : vector<1x256xi1>, vector<1x256xf32>
    %cst_49 = arith.constant 0.000000e+00 : f32
    %577 = vector.broadcast %cst_49 : f32 to vector<1x256xf32>
    %578 = arith.select %146, %458, %577 : vector<1x256xi1>, vector<1x256xf32>
    %cst_50 = arith.constant 0.000000e+00 : f32
    %579 = vector.broadcast %cst_50 : f32 to vector<1x256xf32>
    %580 = arith.select %155, %513, %579 : vector<1x256xi1>, vector<1x256xf32>
    %cst_51 = arith.constant 0.000000e+00 : f32
    %581 = vector.broadcast %cst_51 : f32 to vector<1x256xf32>
    %582 = arith.select %164, %568, %581 : vector<1x256xi1>, vector<1x256xf32>
    %583 = arith.addf %570, %572 : vector<1x256xf32>
    %584 = arith.addf %583, %574 : vector<1x256xf32>
    %585 = arith.addf %584, %576 : vector<1x256xf32>
    %586 = arith.addf %585, %578 : vector<1x256xf32>
    %587 = arith.addf %586, %580 : vector<1x256xf32>
    %588 = arith.addf %587, %582 : vector<1x256xf32>
    %589 = vector.broadcast %98 : f32 to vector<1x256xf32>
    %590 = arith.addf %588, %589 : vector<1x256xf32>
    %591 = arith.negf %590 : vector<1x256xf32>
    %592 = math.exp %591 : vector<1x256xf32>
    %cst_52 = arith.constant 1.000000e+00 : f32
    %593 = vector.broadcast %cst_52 : f32 to vector<1x256xf32>
    %594 = arith.addf %593, %592 : vector<1x256xf32>
    %595 = arith.divf %593, %594 : vector<1x256xf32>
    %c0_53 = arith.constant 0 : index
    %c0_54 = arith.constant 0 : index
    %c0_55 = arith.constant 0 : index
    %596 = vector.load %arg4[%c0_53, %c0_54, %c0_55] : memref<1x1x256xf32, #tpu.memory_space<vmem>>, vector<1x1x256xf32>
    %597 = vector.shape_cast %596 : vector<1x1x256xf32> to vector<1x256xf32>
    %598 = vector.shape_cast %595 : vector<1x256xf32> to vector<1x1x256xf32>
    tpu.vector_store %arg4[%c0_53, %c0_54, %c0_55], %598 {strides = array<i32>} : memref<1x1x256xf32, #tpu.memory_space<vmem>>, vector<1x1x256xf32>,
    return
  }
  func.func @transform_0(%arg0: i32) -> (i32, i32, i32) {
    %c0_i32 = arith.constant 0 : i32
    %c0_i32_0 = arith.constant 0 : i32
    %c0_i32_1 = arith.constant 0 : i32
    return %arg0, %c0_i32, %c0_i32_0 : i32, i32, i32
  }
  func.func @transform_1(%arg0: i32) -> i32 {
    %c0_i32 = arith.constant 0 : i32
    %c0_i32_0 = arith.constant 0 : i32
    return %c0_i32 : i32
  }
  func.func @transform_2(%arg0: i32) -> i32 {
    %c0_i32 = arith.constant 0 : i32
    %c0_i32_0 = arith.constant 0 : i32
    return %c0_i32 : i32
  }
  func.func @transform_3(%arg0: i32) -> (i32, i32, i32) {
    %c0_i32 = arith.constant 0 : i32
    %c0_i32_0 = arith.constant 0 : i32
    %c0_i32_1 = arith.constant 0 : i32
    return %arg0, %c0_i32, %c0_i32_0 : i32, i32, i32
  }
}

</mosaic_0001>

<bundles_post_ra>
// kernel: tpu_custom_call.1
= control target key start
LH: loop header
LB: loop body
LE: loop exit
PB: predicated region body
PF: predicated region fallthrough
CT: control target
= control target key end

     0   :  { %s2527_s0 = inlined_call_operand.hbm [shape: f32[2,4,256], index: 0, kind: input, shape index: {}]   ;;  %s2528_s1 = inlined_call_operand.vmem [shape: f32[98], index: 1, kind: input, shape index: {}]   ;;  %s2529_s2 = inlined_call_operand.<no memory space> [shape: f32[1], index: 2, kind: input, shape index: {}]   ;;  %s2530_s3 = inlined_call_operand.hbm [shape: f32[2,1,256], index: 3, kind: output, shape index: {}]  }
   0x1   :  { %8 = sst [smem:[#allocation3]] %s2529_s2 }
   0x2   :  { %9 = vsyncpa [#allocation5], 0 }
   0x3   :  { %11 = vsyncpa [#allocation5 + $0x1], 0 }
   0x4   :  { %12 = vsyncpa [#allocation7], 0 }
   0x5   :  { %13 = vsyncpa [#allocation6], 0 }
   0x6   :  { %15 = vsyncpa [#allocation6 + $0x1], 0  ;;  %s1869_s14 = smov 0   ;;  %s1871_s15 = smov 0  }
   0x7   :  { %s1873_s16 = smov 0   ;;  %s1875_s17 = smov 0  }
   0x8 LB: > { %s1890_s2 = sadd.s32 4294967295, %s1828_s17   ;;  %s1515_s18 = sadd.s32 4294967294, %s1828_s17   ;;  %s1828_s17 = sphi %s1875_s17, %s2544_s17   ;;  %s1824_s16 = sphi %s1873_s16, %s2543_s16   ;;  %s1820_s15 = sphi %s1871_s15, %s2542_s15   ;;  %s1816_s14 = sphi %s1869_s14, %s2541_s14  }
   0x9   : > { %p41_p0 = scmp.ne.s32.totalorder %s1820_s15, %s1816_s14  ;;  %p42_p1 = scmp.eq.s32.totalorder %s1890_s2, 0 }
   0xa   : > { %p107_p2 = scmp.eq.s32.totalorder %s1890_s2, 1  ;;  %p113_p3 = scmp.eq.s32.totalorder %s1515_s18, 1 }
   0xb   : > { %p1899_p4 = por %p42_p1, %p41_p0  ;;  %p1516_p5 = scmp.ge.s32.totalorder %s1828_s17, 1 }
   0xc   : > { %p1904_p6 = por %p113_p3, %p41_p0  ;;  %p120_p7 = scmp.lt.s32.totalorder %s1828_s17, 3 }
   0xd   : > { %s132_s23 = sshll.u32 %s2528_s1, 4  ;;  %s1920_s25 = sadd.s32 1, %s1828_s17   ;;  %s133_s23 = int_to_ptr.vmem [resolvable:$true] %s132_s23 }
   0xe   : > { %p1912_p8 = pnand %p1516_p5, %p120_p7  ;;  %s25_s26 = ssub.s32 %s1828_s17, %s1920_s25 }
   0xf   : > { %p26_p12 = scmp.eq.s32.totalorder %s25_s26, 0  ;;  %s28_s27 = sadd.s32 1, %s1824_s16 }
  0x10   : > { %p1638_p10 = pneg %p1912_p8  ;;  %p35_p13 = scmp.ne.s32.totalorder %s1824_s16, %s1820_s15 }
  0x11   : > { %s1830_s28 = smov [#allocation8]   ;;  %p36_p0 = scmp.eq.s32.totalorder %s1828_s17, 0 }
  0x12   : > { %p1639_p11 = pnand %p1638_p10, %p42_p1  ;;  %p1935_p3 = por %p107_p2, %p35_p13 }
  0x13   : > { %s1930_s29 = scalar_select %p26_p12, %s1824_s16, %s28_s27  }
  0x14   : > { %1641 = dma.vmem_to_smem (!%p1639_p11), %s133_s23, 16, %s1830_s28, [#allocation7]  }
  0x15   : > { %s146_s4 = sand.u32 1, %s1824_s16   ;;  %p37_p5 = por %p36_p0, %p35_p13 }
  0x16   : > { %p1651_p7 = scmp.lt.s32.totalorder %s1828_s17, 2  ;;  %s1519_s5 = sshll.u32 %s146_s4, 3 }
  0x17   : > { %s1629_s6 = sshll.u32 %s1828_s17, 3  ;;  %s150_s11 = scalar_lea.vmem [#allocation4], %s1519_s5 }
  0x18   : > { %s155_s9 = scalar_lea.hbm %s2527_s0, %s1629_s6  ;;  %s159_s12 = sshll.u32 %s150_s11, 4  ;;  %s160_s12 = int_to_ptr.vmem [resolvable:$true] %s159_s12 }
  0x19   : > { %s157_s10 = sshll.u32 %s155_s9, 4  ;;  %p1945_p10 = pnand %p1651_p7, %p37_p5  ;;  %s158_s10 = int_to_ptr.hbm [resolvable:$true] %s157_s10 }
  0x1a   : > { %s147_s18 = scalar_lea.sflag [#allocation5], %s146_s4  ;;  %s1728_s21 = sshra.s32 %s158_s10, 4  ;;  %s1729_s21 = int_to_ptr.hbm [resolvable:$true] %s1728_s21 }
  0x1b   : > { %s1730_s22 = scalar_lea.hbm %s1729_s21, 8  ;;  %p1732_p11 = pneg %p1945_p10 }
  0x1c   : > { %p1731_p2 = scmp.ne.s32.totalorder %s1729_s21, %s1730_s22  ;;  %s1735_s27 = scalar_lea.hbm %s2527_s0, 16 }
  0x1d   : > { %p1736_p0 = scmp.lt.s32.totalorder %s1729_s21, %s2527_s0  ;;  %p1737_p5 = scmp.lt.s32.totalorder %s1735_s27, %s1730_s22 }
  0x1e   : > { %p1733_p12 = pnand %p1732_p11, %p1731_p2 }
  0x1f   : > { %p1738_p7 = por %p1737_p5, %p1736_p0 }
  0x20   : > { %p1734_p13 = pneg %p1733_p12 }
  0x22   : > { %p1739_p9 = pnand %p1738_p7, %p1734_p13 }
  0x24   : > { %1742 = shalt.err (!%p1739_p9)
}
  0x25   : > { %1645 = dma.hbm_to_vmem [thread:$0]  (!%p1945_p10), %s158_s10, 128, %s160_s12, %s147_s18  }
  0x26   : > { %168 = sbr.rel (%p1912_p8) target bundleno = 705 (0x2c1), region = 32  ;;  %s1962_s4 = sand.u32 (!%p1912_p8), 1, %s1820_s15  }
  0x27   : > { %s1523_s6 = sshll.u32 (!%p1912_p8), %s1962_s4, 3  ;;  %s171_s7 = scalar_lea.sflag (!%p1912_p8), [#allocation5], %s1962_s4 }
  0x28   : > { %s174_s8 = scalar_lea.vmem (!%p1912_p8), [#allocation4], %s1523_s6 }
  0x2b   : > { %1803 = dma.done.wait (%p1899_p4), %s171_s7, 128  }
  0x2c   : > { %1805 = vsyncadd (%p1899_p4), %s171_s7, 4294967168 }
  0x2d   : > { %1807 = dma.done.wait (%p42_p1), [#allocation7], 16  }
  0x2e   : > { %1809 = vsyncadd (%p42_p1), [#allocation7], 4294967280 }
  0x2f   : > { %185 = sfence }
  0x30   : > { %v373_v0 = vld [vmem:[%s174_s8] sm:$0xff]  ;;  %v1831_v1 = vmov 4.0   ;;  %vm380_vm0 = vcmask 1043456   ;;  %vm407_vm2 = vcmask 1040384   ;;  %s1832_s19 = smov 51   ;;  %v303_v46 = vlaneseq  ;;  %s1560_s24 = sld [smem:[#allocation8 + $0x23]] }
  0x31   : > { %375 = vst [vmem:[#allocation1] ss:$2 sm:$0xff] %v373_v0  ;;  %1702 = vrcp.f32 %v1831_v1  ;;  %v1833_v48 = vmov 0.0   ;;  %vm412_vm8 = vcmask 416768   ;;  %s1546_s9 = sld [smem:[#allocation8 + $0x15]]  ;;  %s1834_s18 = smov 48  }
  0x32   : > { %vm364_vm3 = vcmp.lt.s32.totalorder %v303_v46, 51  ;;  %vm1982_vm4 = vcmp.ge.s32.totalorder %v303_v46, 51  ;;  %vm369_vm5 = vcmp.lt.s32.totalorder %v303_v46, 102  ;;  %vm1990_vm7 = vcmp.lt.s32.totalorder %v303_v46, 307  ;;  %s1532_s10 = sld [smem:[#allocation8 + $0x7]]  ;;  %s1835_s21 = smov 80  }
  0x33   : > { %366 = vst.msk [vmem:[#allocation2] sm:$0x1] %vm364_vm3, %v1833_v48  ;;  %vm370_vm6 = vmand %vm1982_vm4, %vm369_vm5  ;;  %s1553_s11 = sld [smem:[#allocation8 + $0x1c]]  ;;  %s1836_s22 = smov 112   ;;  %vm458_vm10 = vcmask 916480   ;;  %vm468_vm11 = vcmask 785408  }
  0x34   : > { %371 = vst.msk [vmem:[#allocation2 + $0x2] sm:$0x1] %vm370_vm6, %v1833_v48  ;;  %vm416_vm9 = vmand %vm1982_vm4, %vm1990_vm7  ;;  %s1540_s12 = sld [smem:[#allocation8 + $0xf]]  ;;  %s1837_s28 = smov 64   ;;  %vm478_vm12 = vcmask 654336   ;;  %vm488_vm13 = vcmask 523264  }
  0x35   : > { %367 = vst.msk [vmem:[#allocation2 + $0x3] sm:$0x1] %vm364_vm3, %v1833_v48  ;;  %s1539_s13 = sld [smem:[#allocation8 + $0xe]]  ;;  %s1838_s5 = smov 96   ;;  %vm498_vm14 = vcmask 392192   ;;  %vm508_vm15 = vcmask 261120  }
  0x36   : > { %372 = vst.msk [vmem:[#allocation2 + $0x5] sm:$0x1] %vm370_vm6, %v1833_v48  ;;  %v492_v53 = vstv %s1560_s24  ;;  %s1561_s23 = sld [smem:[#allocation8 + $0x24]] }
  0x37   : > { %v1703_v2 = vpop.eup %1702  ;;  %v472_v54 = vstv %s1546_s9  ;;  %s1533_s26 = sld [smem:[#allocation8 + $0x8]] }
  0x38   : > { %v376_v3 = vld.sshfl [vmem:[#allocation1] sm:$0xff pattern:$0x75316420]  ;;  %v377_v4 = vld.sshfl [vmem:[#allocation1 + $0x8] sm:$0xff pattern:$0x75316420]  ;;  %vm400_vm1 = vweird.f32 %v1703_v2  ;;  %v452_v55 = vstv %s1532_s10 }
  0x39   : > { %v381_v5 = vsel %vm380_vm0, %v376_v3, 0.0  ;;  %v388_v6 = vsel %vm380_vm0, %v377_v4, 0.0  ;;  %v396_v7 = vmul.f32 4.0, %v1703_v2  ;;  %418 = vst [vmem:[#allocation1] ss:$2 sm:$0xff] %v373_v0  ;;  %v482_v60 = vstv %s1553_s11  ;;  %s1567_s27 = sld [smem:[#allocation8 + $0x2a]] }
  0x3a   : > { %v382_v8 = vrot.slane %v381_v5, 4  ;;  %v389_v9 = vrot.slane %v388_v6, 4  ;;  %v580_v61 = vstv %s1540_s12  ;;  %s1541_s6 = sld [smem:[#allocation8 + $0x10]] }
  0x3b   : > { %v397_v10 = vsub.f32 1.0, %v396_v7  ;;  %v462_v62 = vstv %s1539_s13  ;;  %s1554_s7 = sld [smem:[#allocation8 + $0x1d]] }
  0x3c   : > { %v383_v11 = vadd.f32 %v382_v8, %v381_v5  ;;  %v390_v12 = vadd.f32 %v389_v9, %v388_v6  ;;  %s1547_s8 = sld [smem:[#allocation8 + $0x16]] }
  0x3d   : > { %v398_v13 = vmul.f32 %v1703_v2, %v397_v10  ;;  %v571_v3 = vstv %s1533_s26  ;;  %s1562_s24 = sld [smem:[#allocation8 + $0x25]] }
  0x3e   : > { %v384_v14 = vrot.slane %v383_v11, 2  ;;  %v391_v15 = vrot.slane %v390_v12, 2  ;;  %s1534_s9 = sld [smem:[#allocation8 + $0x9]] }
  0x3f   : > { %v399_v16 = vadd.f32 %v1703_v2, %v398_v13  ;;  %v502_v4 = vstv %s1567_s27  ;;  %s1568_s10 = sld [smem:[#allocation8 + $0x2b]] }
  0x40   : > { %v385_v17 = vadd.f32 %v384_v14, %v383_v11  ;;  %v392_v18 = vadd.f32 %v391_v15, %v390_v12  ;;  %v419_v19 = vld.sshfl [vmem:[#allocation1] sm:$0xff pattern:$0x75316420]  ;;  %v420_v20 = vld.sshfl [vmem:[#allocation1 + $0x8] sm:$0xff pattern:$0x75316420]  ;;  %v693_v8 = vstv %s1541_s6 }
  0x41   : > { %v423_v21 = vsel %vm380_vm0, %v419_v19, -inf  ;;  %v430_v22 = vsel %vm380_vm0, %v420_v20, -inf  ;;  %v401_v27 = vsel %vm400_vm1, %v1703_v2, %v399_v16  ;;  %v607_v2 = vstv %s1561_s23  ;;  %s1542_s11 = sld [smem:[#allocation8 + $0x11]] }
  0x42   : > { %v386_v23 = vrot.slane %v385_v17, 1  ;;  %v393_v24 = vrot.slane %v392_v18, 1  ;;  %v424_v25 = vrot.slane %v423_v21, 4  ;;  %v431_v26 = vrot.slane %v430_v22, 4  ;;  %s1555_s12 = sld [smem:[#allocation8 + $0x1e]] }
  0x43   : > { %v598_v9 = vstv %s1554_s7  ;;  %v589_v10 = vstv %s1547_s8  ;;  %v720_v14 = vstv %s1562_s24  ;;  %s1548_s13 = sld [smem:[#allocation8 + $0x17]]  ;;  %vm1264_vm0 = vcmask 1039360  }
  0x44   : > { %v387_v28 = vadd.f32 %v386_v23, %v385_v17  ;;  %v394_v29 = vadd.f32 %v393_v24, %v392_v18  ;;  %v425_v30 = vmax.f32 %v423_v21, %v424_v25  ;;  %v432_v31 = vmax.f32 %v430_v22, %v431_v26  ;;  %s1563_s23 = sld [smem:[#allocation8 + $0x26]] }
  0x45   : > { %v684_v15 = vstv %s1534_s9  ;;  %v616_v16 = vstv %s1568_s10  ;;  %s1535_s26 = sld [smem:[#allocation8 + $0xa]]  ;;  %vm1281_vm1 = vcmask 1031168  }
  0x46   : > { %v402_v32 = vmul.f32 %v401_v27, %v387_v28  ;;  %v403_v33 = vmul.f32 %v401_v27, %v394_v29  ;;  %v426_v34 = vrot.slane %v425_v30, 2  ;;  %v433_v35 = vrot.slane %v432_v31, 2  ;;  %s1569_s27 = sld [smem:[#allocation8 + $0x2c]] }
  0x47   : > { %v806_v20 = vstv %s1542_s11  ;;  %s1543_s6 = sld [smem:[#allocation8 + $0x12]] }
  0x48   : > { %v406_v36 = vrot.slane %v403_v33, 7  ;;  %v427_v37 = vmax.f32 %v425_v30, %v426_v34  ;;  %v434_v38 = vmax.f32 %v432_v31, %v433_v35  ;;  %v711_v21 = vstv %s1555_s12  ;;  %s1556_s7 = sld [smem:[#allocation8 + $0x1f]] }
  0x49   : > { %v702_v22 = vstv %s1548_s13  ;;  %s1549_s8 = sld [smem:[#allocation8 + $0x18]] }
  0x4a   : > { %v408_v39 = vsel %vm407_vm2, %v402_v32, %v406_v36  ;;  %v428_v40 = vrot.slane %v427_v37, 1  ;;  %v435_v41 = vrot.slane %v434_v38, 1  ;;  %v833_v28 = vstv %s1563_s23  ;;  %s1564_s24 = sld [smem:[#allocation8 + $0x27]] }
  0x4b   : > { %409 = vrot.lane.b32.xlu0 %v408_v39, %s1832_s19  ;;  %v797_v29 = vstv %s1535_s26  ;;  %s1536_s9 = sld [smem:[#allocation8 + $0xb]] }
  0x4c   : > { %v429_v42 = vmax.f32 %v427_v37, %v428_v40  ;;  %v436_v43 = vmax.f32 %v434_v38, %v435_v41  ;;  %v729_v30 = vstv %s1569_s27  ;;  %s1570_s10 = sld [smem:[#allocation8 + $0x2d]] }
  0x4d   : > { %v919_v35 = vstv %s1543_s6  ;;  %s1538_s11 = sld [smem:[#allocation8 + $0xd]] }
  0x4e   : > { %v439_v44 = vrot.slane %v436_v43, 7  ;;  %v824_v36 = vstv %s1556_s7  ;;  %s1557_s12 = sld [smem:[#allocation8 + $0x20]] }
  0x4f   : > { %v815_v37 = vstv %s1549_s8  ;;  %s1550_s13 = sld [smem:[#allocation8 + $0x19]] }
  0x50   : > { %v440_v45 = vsel %vm407_vm2, %v429_v42, %v439_v44  ;;  %v946_v41 = vstv %s1564_s24  ;;  %s1558_s23 = sld [smem:[#allocation8 + $0x21]] }
  0x51   : > { %v910_v42 = vstv %s1536_s9  ;;  %s1544_s26 = sld [smem:[#allocation8 + $0x13]] }
  0x52   : > { %v842_v43 = vstv %s1570_s10  ;;  %s1537_s27 = sld [smem:[#allocation8 + $0xc]] }
  0x53   : > { %441 = vrot.lane.b32.xlu0 %v440_v45, %s1832_s19  ;;  %s1839_s19 = smov 32   ;;  %v1136_v48 = vstv %s1538_s11  ;;  %s1588_s6 = sld [smem:[#allocation8 + $0x3f]] }
  0x54   : > { %v937_v49 = vstv %s1557_s12  ;;  %s1545_s7 = sld [smem:[#allocation8 + $0x14]] }
  0x55   : > { %s1551_s8 = sld [smem:[#allocation8 + $0x1a]] }
  0x56   : > { %s1609_s24 = sld [smem:[#allocation8 + $0x54]] }
  0x57   : > { %s1571_s9 = sld [smem:[#allocation8 + $0x2e]] }
  0x58   : > { %s1552_s10 = sld [smem:[#allocation8 + $0x1b]] }
  0x59   : > { %s1589_s11 = sld [smem:[#allocation8 + $0x40]] }
  0x5a   : > { %s1581_s12 = sld [smem:[#allocation8 + $0x38]] }
  0xbd   : > { %v410_v50 = vpop.permute.xlu0 %409 }
  0xbe   : > { %v411_v51 = vrot.slane %v410_v50, 7 }
  0xc0   : > { %v413_v52 = vsel %vm412_vm8, %v411_v51, %v410_v50  ;;  %v928_v50 = vstv %s1550_s13  ;;  %s1595_s13 = sld [smem:[#allocation8 + $0x46]] }
  0xc1   : > { %417 = vst.msk [vmem:[#allocation2] sm:$0x7] %vm416_vm9, %v413_v52 }
  0xc5   : > { %v442_v26 = vpop.permute.xlu0 %441 }
  0xc6   : > { %v443_v27 = vrot.slane %v442_v26, 7 }
  0xc8   : > { %v2004_v56 = vld [vmem:[#allocation2] sm:$0x7]  ;;  %v444_v31 = vsel %vm412_vm8, %v443_v27, %v442_v26 }
  0xc9   : > { %v493_v57 = vmul.f32 %v492_v53, %v2004_v56  ;;  %v473_v58 = vmul.f32 %v472_v54, %v2004_v56  ;;  %v453_v59 = vmul.f32 %v452_v55, %v2004_v56  ;;  %v483_v63 = vmul.f32 %v482_v60, %v2004_v56  ;;  %447 = vst.msk [vmem:[#allocation2 + $0x3] sm:$0x7] %vm416_vm9, %v444_v31 }
  0xca   : > { %v581_v0 = vmul.f32 %v580_v61, %v2004_v56  ;;  %v463_v1 = vmul.f32 %v462_v62, %v2004_v56  ;;  %v608_v5 = vmul.f32 %v607_v2, %v2004_v56  ;;  %v572_v6 = vmul.f32 %v571_v3, %v2004_v56 }
  0xcb   : > { %495 = vrot.lane.b32.xlu0 %v493_v57, %s1834_s18  ;;  %475 = vrot.lane.b32.xlu2 %v473_v58, %s1835_s21  ;;  %v503_v7 = vmul.f32 %v502_v4, %v2004_v56  ;;  %v694_v11 = vmul.f32 %v693_v8, %v2004_v56  ;;  %v599_v12 = vmul.f32 %v598_v9, %v2004_v56  ;;  %v1050_v54 = vstv %s1558_s23  ;;  %s1526_s23 = sld [smem:[#allocation8 + $0x1]] }
  0xcc   : > { %455 = vrot.lane.b32.xlu1 %v453_v59, %s1836_s22  ;;  %v590_v13 = vmul.f32 %v589_v10, %v2004_v56  ;;  %v721_v17 = vmul.f32 %v720_v14, %v2004_v56  ;;  %v685_v18 = vmul.f32 %v684_v15, %v2004_v56  ;;  %v617_v19 = vmul.f32 %v616_v16, %v2004_v56 }
  0xcd   : > { %v807_v23 = vmul.f32 %v806_v20, %v2004_v56  ;;  %v712_v24 = vmul.f32 %v711_v21, %v2004_v56  ;;  %v703_v25 = vmul.f32 %v702_v22, %v2004_v56  ;;  %v834_v32 = vmul.f32 %v833_v28, %v2004_v56 }
  0xce   : > { %v798_v33 = vmul.f32 %v797_v29, %v2004_v56  ;;  %v730_v34 = vmul.f32 %v729_v30, %v2004_v56  ;;  %v920_v38 = vmul.f32 %v919_v35, %v2004_v56  ;;  %v825_v39 = vmul.f32 %v824_v36, %v2004_v56 }
  0xcf   : > { %v816_v40 = vmul.f32 %v815_v37, %v2004_v56  ;;  %v947_v44 = vmul.f32 %v946_v41, %v2004_v56  ;;  %v911_v45 = vmul.f32 %v910_v42, %v2004_v56  ;;  %v843_v47 = vmul.f32 %v842_v43, %v2004_v56 }
  0xd0   : > { %v1137_v51 = vmul.f32 %v1136_v48, %v2004_v56  ;;  %v938_v52 = vmul.f32 %v937_v49, %v2004_v56  ;;  %v929_v53 = vmul.f32 %v928_v50, %v2004_v56  ;;  %v1032_v55 = vstv %s1544_s26  ;;  %v2077_v61 = vld [vmem:[#allocation2 + $0x3] sm:$0x7]  ;;  %s1610_s26 = sld [smem:[#allocation8 + $0x55]] }
  0xd1   : > { %v1023_v57 = vstv %s1537_s27  ;;  %v1051_v58 = vmul.f32 %v1050_v54, %v2004_v56  ;;  %v1033_v59 = vmul.f32 %v1032_v55, %v2004_v56  ;;  %v524_v62 = vstv %s1588_s6  ;;  %s1602_s27 = sld [smem:[#allocation8 + $0x4d]] }
  0xd2   : > { %v1024_v60 = vmul.f32 %v1023_v57, %v2004_v56  ;;  %v551_v4 = vstv %s1609_s24  ;;  %v1154_v8 = vstv %s1552_s10  ;;  %v533_v14 = vstv %s1595_s13  ;;  %s1616_s6 = sld [smem:[#allocation8 + $0x5b]] }
  0xd3   : > { %485 = vrot.lane.b32.xlu2 %v483_v63, %s1837_s28  ;;  %583 = vrot.lane.b32.xlu0 %v581_v0, %s1838_s5  ;;  %v1145_v63 = vstv %s1545_s7  ;;  %v525_v0 = vmul.f32 %v524_v62, %v2077_v61  ;;  %v1155_v10 = vmul.f32 %v1154_v8, %v2004_v56  ;;  %s2102_s7 = sld [smem:[#allocation8]]  ;;  %vm1315_vm9 = vcmask 1014784  }
  0xd4   : > { %465 = vrot.lane.b32.xlu1 %v463_v1, %s1838_s5  ;;  %v1041_v1 = vstv %s1551_s8  ;;  %v1146_v2 = vmul.f32 %v1145_v63, %v2004_v56  ;;  %s1590_s8 = sld [smem:[#allocation8 + $0x41]] }
  0xd5   : > { %v1042_v3 = vmul.f32 %v1041_v1, %v2004_v56  ;;  %s1582_s24 = sld [smem:[#allocation8 + $0x39]] }
  0xd6   : > { %v664_v21 = vstv %s1610_s26  ;;  %s2111_s10 = sld [smem:[#allocation8 + $0x2]] }
  0xd7   : > { %v542_v22 = vstv %s1602_s27  ;;  %v665_v27 = vmul.f32 %v664_v21, %v2077_v61  ;;  %s2123_s13 = sld [smem:[#allocation8 + $0x5c]] }
  0xd8   : > { %v543_v28 = vmul.f32 %v542_v22, %v2077_v61  ;;  %s2138_s26 = sld [smem:[#allocation8 + $0x3a]] }
  0xd9   : > { %s2141_s27 = sld [smem:[#allocation8 + $0x48]] }
  0xdb   : > { %610 = vrot.lane.b32.xlu0 %v608_v5, %s1834_s18  ;;  %574 = vrot.lane.b32.xlu2 %v572_v6, %s1836_s22  ;;  %v955_v6 = vstv %s1571_s9  ;;  %s1596_s9 = sld [smem:[#allocation8 + $0x47]]  ;;  %v628_v35 = vstv %s1582_s24 }
  0xdc   : > { %505 = vrot.lane.b32.xlu1 %v503_v7, %s1839_s19  ;;  %v552_v7 = vmul.f32 %v551_v4, %v2077_v61  ;;  %v956_v9 = vmul.f32 %v955_v6, %v2004_v56  ;;  %v629_v41 = vmul.f32 %v628_v35, %v2077_v61  ;;  %s2170_s24 = sld [smem:[#allocation8 + $0x4f]] }
  0xdd   : > { %v673_v57 = vstv %s2123_s13  ;;  %s2202_s13 = sld [smem:[#allocation8 + $0x32]] }
  0xde   : > { %v674_v4 = vmul.f32 %v673_v57, %v2077_v61 }
  0xe1   : > { %v646_v37 = vstv %s1596_s9  ;;  %s2177_s9 = sld [smem:[#allocation8 + $0x5d]] }
  0xe2   : > { %v647_v43 = vmul.f32 %v646_v37, %v2077_v61 }
  0xe3   : > { %696 = vrot.lane.b32.xlu0 %v694_v11, %s1838_s5  ;;  %601 = vrot.lane.b32.xlu2 %v599_v12, %s1837_s28  ;;  %v637_v12 = vstv %s1589_s11  ;;  %s2114_s11 = sld [smem:[#allocation8 + $0x56]] }
  0xe4   : > { %592 = vrot.lane.b32.xlu1 %v590_v13, %s1835_s21  ;;  %v515_v13 = vstv %s1581_s12  ;;  %v638_v15 = vmul.f32 %v637_v12, %v2077_v61  ;;  %s2121_s12 = sld [smem:[#allocation8 + $0x4e]] }
  0xe5   : > { %v516_v16 = vmul.f32 %v515_v13, %v2077_v61 }
  0xe9   : > { %v777_v48 = vstv %s2114_s11  ;;  %s2195_s11 = sld [smem:[#allocation8 + $0x3b]] }
  0xea   : > { %v655_v49 = vstv %s2121_s12  ;;  %s2197_s12 = sld [smem:[#allocation8 + $0x49]] }
  0xeb   : > { %723 = vrot.lane.b32.xlu0 %v721_v17, %s1834_s18  ;;  %687 = vrot.lane.b32.xlu2 %v685_v18, %s1836_s22  ;;  %v534_v17 = vmul.f32 %v533_v14, %v2077_v61  ;;  %v569_v18 = vstv %s1526_s23  ;;  %s2134_s23 = sld [smem:[#allocation8 + $0x42]]  ;;  %v656_v62 = vmul.f32 %v655_v49, %v2077_v61 }
  0xec   : > { %619 = vrot.lane.b32.xlu1 %v617_v19, %s1839_s19 }
  0xf1   : > { %v863_v14 = vstv %s2134_s23  ;;  %s2215_s23 = sld [smem:[#allocation8 + $0x4]] }
  0xf2   : > { %v864_v21 = vmul.f32 %v863_v14, %v2077_v61 }
  0xf3   : > { %809 = vrot.lane.b32.xlu0 %v807_v23, %s1838_s5  ;;  %714 = vrot.lane.b32.xlu2 %v712_v24, %s1837_s28  ;;  %v570_v23 = vmul.f32 %v569_v18, %v2004_v56  ;;  %v560_v24 = vstv %s1616_s6  ;;  %s2145_s6 = sld [smem:[#allocation8 + $0x31]]  ;;  %v759_v18 = vstv %s2141_s27 }
  0xf4   : > { %705 = vrot.lane.b32.xlu1 %v703_v25, %s1835_s21  ;;  %v561_v29 = vmul.f32 %v560_v24, %v2077_v61  ;;  %v760_v24 = vmul.f32 %v759_v18, %v2077_v61  ;;  %s2223_s27 = sld [smem:[#allocation8 + $0x50]] }
  0xfb   : > { %836 = vrot.lane.b32.xlu0 %v834_v32, %s1834_s18  ;;  %800 = vrot.lane.b32.xlu2 %v798_v33, %s1836_s22  ;;  %v450_v32 = vstv %s2102_s7  ;;  %s2161_s7 = sld [smem:[#allocation8 + $0x3]] }
  0xfc   : > { %732 = vrot.lane.b32.xlu1 %v730_v34, %s1839_s19  ;;  %v750_v34 = vstv %s1590_s8  ;;  %s2164_s8 = sld [smem:[#allocation8 + $0x57]] }
 0x103   : > { %922 = vrot.lane.b32.xlu0 %v920_v38, %s1838_s5  ;;  %827 = vrot.lane.b32.xlu2 %v825_v39, %s1837_s28  ;;  %v451_v38 = vmul.f32 %v450_v32, %v2004_v56  ;;  %v768_v32 = vstv %s2170_s24  ;;  %s2248_s24 = sld [smem:[#allocation8 + $0x43]] }
 0x104   : > { %818 = vrot.lane.b32.xlu1 %v816_v40, %s1835_s21  ;;  %v751_v40 = vmul.f32 %v750_v34, %v2077_v61 }
 0x10b   : > { %949 = vrot.lane.b32.xlu0 %v947_v44, %s1834_s18  ;;  %913 = vrot.lane.b32.xlu2 %v911_v45, %s1836_s22  ;;  %v682_v44 = vstv %s2111_s10  ;;  %s2189_s10 = sld [smem:[#allocation8 + $0x28]] }
 0x10c   : > { %845 = vrot.lane.b32.xlu1 %v843_v47, %s1839_s19 }
 0x113   : > { %1139 = vrot.lane.b32.xlu0 %v1137_v51, %s1836_s22  ;;  %940 = vrot.lane.b32.xlu2 %v938_v52, %s1837_s28  ;;  %v683_v51 = vmul.f32 %v682_v44, %v2004_v56 }
 0x114   : > { %931 = vrot.lane.b32.xlu1 %v929_v53, %s1835_s21 }
 0x11b   : > { %1053 = vrot.lane.b32.xlu0 %v1051_v58, %s1837_s28  ;;  %1035 = vrot.lane.b32.xlu2 %v1033_v59, %s1838_s5 }
 0x11c   : > { %1026 = vrot.lane.b32.xlu1 %v1024_v60, %s1836_s22  ;;  %v778_v60 = vmul.f32 %v777_v48, %v2077_v61 }
 0x123   : > { %527 = vrot.lane.b32.xlu0 %v525_v0, %s1838_s5  ;;  %1148 = vrot.lane.b32.xlu2 %v1146_v2, %s1838_s5 }
 0x124   : > { %1044 = vrot.lane.b32.xlu1 %v1042_v3, %s1835_s21 }
 0x125   : > { %v2086_v5 = vpop.permute.xlu2 %475 }
 0x126   : > { %v477_v54 = vrot.slane %v2086_v5, 1 }
 0x128   : > { %v479_v6 = vsel %vm478_vm12, %v2086_v5, %v477_v54 }
 0x12b   : > { %554 = vrot.lane.b32.xlu0 %v552_v7, %s1834_s18  ;;  %958 = vrot.lane.b32.xlu2 %v956_v9, %s1839_s19 }
 0x12c   : > { %1157 = vrot.lane.b32.xlu1 %v1155_v10, %s1835_s21 }
 0x12d   : > { %v2094_v11 = vpop.permute.xlu2 %485 }
 0x12e   : > { %v487_v63 = vrot.slane %v2094_v11, 1 }
 0x130   : > { %v489_v5 = vsel %vm488_vm13, %v2094_v11, %v487_v63  ;;  %v625_v63 = vstv %s2202_s13  ;;  %s2287_s13 = sld [smem:[#allocation8 + $0x4b]] }
 0x133   : > { %640 = vrot.lane.b32.xlu0 %v638_v15, %s1838_s5  ;;  %518 = vrot.lane.b32.xlu2 %v516_v16, %s1836_s22  ;;  %v741_v15 = vstv %s2138_s26  ;;  %s2218_s26 = sld [smem:[#allocation8 + $0x29]] }
 0x134   : > { %536 = vrot.lane.b32.xlu1 %v534_v17, %s1835_s21  ;;  %v742_v22 = vmul.f32 %v741_v15, %v2077_v61 }
 0x135   : > { %v575_v19 = vpop.permute.xlu2 %574 }
 0x136   : > { %v576_v20 = vrot.slane %v575_v19, 1 }
 0x138   : > { %v577_v25 = vsel %vm458_vm10, %v575_v19, %v576_v20  ;;  %v512_v19 = vstv %s2145_s6  ;;  %s2228_s6 = sld [smem:[#allocation8 + $0x5e]] }
 0x139   : > { %v579_v26 = vadd.f32 %v577_v25, %v570_v23  ;;  %v513_v25 = vmul.f32 %v512_v19, %v2077_v61 }
 0x13b   : > { %667 = vrot.lane.b32.xlu0 %v665_v27, %s1834_s18  ;;  %545 = vrot.lane.b32.xlu2 %v543_v28, %s1837_s28 }
 0x13c   : > { %563 = vrot.lane.b32.xlu1 %v561_v29, %s1839_s19 }
 0x13d   : > { %v2116_v30 = vpop.permute.xlu0 %495  ;;  %v2118_v31 = vpop.permute.xlu2 %601 }
 0x13e   : > { %v456_v33 = vpop.permute.xlu1 %455  ;;  %v497_v7 = vrot.slane %v2116_v30, 1 }
 0x13f   : > { %v457_v36 = vrot.slane %v456_v33, 1 }
 0x140   : > { %v499_v16 = vsel %vm498_vm14, %v2116_v30, %v497_v7  ;;  %v890_v30 = vstv %s2164_s8  ;;  %v908_v7 = vstv %s2215_s23  ;;  %s2246_s8 = sld [smem:[#allocation8 + $0x22]] }
 0x141   : > { %v459_v39 = vsel %vm458_vm10, %v456_v33, %v457_v36  ;;  %v603_v36 = vrot.slane %v2118_v31, 1  ;;  %v909_v18 = vmul.f32 %v908_v7, %v2004_v56  ;;  %s2294_s23 = sld [smem:[#allocation8 + $0x4a]] }
 0x142   : > { %v461_v42 = vadd.f32 %v459_v39, %v451_v38  ;;  %v786_v39 = vstv %s2177_s9  ;;  %s2253_s9 = sld [smem:[#allocation8 + $0x33]] }
 0x143   : > { %753 = vrot.lane.b32.xlu0 %v751_v40, %s1838_s5  ;;  %631 = vrot.lane.b32.xlu2 %v629_v41, %s1836_s22 }
 0x144   : > { %649 = vrot.lane.b32.xlu1 %v647_v43, %s1835_s21  ;;  %v769_v43 = vmul.f32 %v768_v32, %v2077_v61 }
 0x145   : > { %v584_v45 = vpop.permute.xlu0 %583  ;;  %v688_v47 = vpop.permute.xlu2 %687 }
 0x146   : > { %v585_v50 = vrot.slane %v584_v45, 1  ;;  %v689_v52 = vrot.slane %v688_v47, 1  ;;  %v466_v53 = vpop.permute.xlu1 %465 }
 0x147   : > { %v467_v55 = vrot.slane %v466_v53, 1 }
 0x148   : > { %v586_v58 = vsel %vm468_vm11, %v584_v45, %v585_v50  ;;  %v690_v59 = vsel %vm458_vm10, %v688_v47, %v689_v52  ;;  %v787_v50 = vmul.f32 %v786_v39, %v2077_v61  ;;  %v976_v39 = vstv %s2248_s24  ;;  %s2323_s24 = sld [smem:[#allocation8 + $0x3e]] }
 0x149   : > { %v2152_v0 = vadd.f32 %v586_v58, %v579_v26  ;;  %v692_v1 = vadd.f32 %v690_v59, %v683_v51  ;;  %v469_v2 = vsel %vm468_vm11, %v466_v53, %v467_v55  ;;  %v795_v26 = vstv %s2161_s7  ;;  %s2240_s7 = sld [smem:[#allocation8 + $0x2f]] }
 0x14a   : > { %v471_v3 = vadd.f32 %v469_v2, %v461_v42  ;;  %v796_v37 = vmul.f32 %v795_v26, %v2004_v56  ;;  %v891_v42 = vmul.f32 %v890_v30, %v2077_v61  ;;  %v604_v51 = vsel %vm488_vm13, %v2118_v31, %v603_v36 }
 0x14b   : > { %780 = vrot.lane.b32.xlu0 %v778_v60, %s1834_s18  ;;  %658 = vrot.lane.b32.xlu2 %v656_v62, %s1837_s28  ;;  %v1059_v58 = vstv %s2189_s10  ;;  %v854_v59 = vstv %s2195_s11  ;;  %s2269_s10 = sld [smem:[#allocation8 + $0x30]] }
 0x14c   : > { %v481_v8 = vadd.f32 %v479_v6, %v471_v3  ;;  %676 = vrot.lane.b32.xlu1 %v674_v4, %s1839_s19  ;;  %v872_v62 = vstv %s2197_s12  ;;  %v855_v2 = vmul.f32 %v854_v59, %v2077_v61  ;;  %v626_v6 = vmul.f32 %v625_v63, %v2077_v61  ;;  %s2273_s11 = sld [smem:[#allocation8 + $0x44]] }
 0x14d   : > { %v611_v9 = vpop.permute.xlu0 %610  ;;  %v2168_v10 = vpop.permute.xlu2 %714  ;;  %v873_v4 = vmul.f32 %v872_v62, %v2077_v61  ;;  %s2276_s12 = sld [smem:[#allocation8 + $0x3c]] }
 0x14e   : > { %v506_v12 = vpop.permute.xlu1 %505  ;;  %v491_v13 = vadd.f32 %v489_v5, %v481_v8  ;;  %v612_v44 = vrot.slane %v611_v9, 1 }
 0x14f   : > { %v507_v17 = vrot.slane %v506_v12, 1 }
 0x150   : > { %v501_v11 = vadd.f32 %v499_v16, %v491_v13  ;;  %v613_v53 = vsel %vm498_vm14, %v611_v9, %v612_v44  ;;  %v881_v13 = vstv %s2223_s27  ;;  %v977_v44 = vmul.f32 %v976_v39, %v2077_v61  ;;  %s2301_s27 = sld [smem:[#allocation8 + $0x34]] }
 0x151   : > { %v509_v20 = vsel %vm508_vm15, %v506_v12, %v507_v17  ;;  %v1172_v12 = vstv %s2218_s26  ;;  %v716_v17 = vrot.slane %v2168_v10, 1  ;;  %s2297_s26 = sld [smem:[#allocation8 + $0x3d]] }
 0x152   : > { %v511_v23 = vadd.f32 %v509_v20, %v501_v11  ;;  %v899_v11 = vstv %s2228_s6  ;;  %s2313_s6 = sld [smem:[#allocation8 + $0x6]] }
 0x153   : > { %866 = vrot.lane.b32.xlu0 %v864_v21, %s1838_s5  ;;  %744 = vrot.lane.b32.xlu2 %v742_v22, %s1836_s22  ;;  %v1173_v22 = vmul.f32 %v1172_v12, %v2004_v56  ;;  %v900_v30 = vmul.f32 %v899_v11, %v2077_v61  ;;  %v717_v32 = vsel %vm488_vm13, %v2168_v10, %v716_v17 }
 0x154   : > { %762 = vrot.lane.b32.xlu1 %v760_v24, %s1835_s21  ;;  %v2191_v27 = vadd.f32 %v513_v25, %v511_v23  ;;  %v882_v23 = vmul.f32 %v881_v13, %v2077_v61 }
 0x155   : > { %v697_v28 = vpop.permute.xlu0 %696  ;;  %v801_v29 = vpop.permute.xlu2 %800 }
 0x156   : > { %v698_v33 = vrot.slane %v697_v28, 1  ;;  %v802_v34 = vrot.slane %v801_v29, 1  ;;  %v593_v35 = vpop.permute.xlu1 %592 }
 0x157   : > { %v594_v38 = vrot.slane %v593_v35, 1 }
 0x158   : > { %v699_v40 = vsel %vm468_vm11, %v697_v28, %v698_v33  ;;  %v803_v41 = vsel %vm458_vm10, %v801_v29, %v802_v34 }
 0x159   : > { %v701_v45 = vadd.f32 %v699_v40, %v692_v1  ;;  %v805_v47 = vadd.f32 %v803_v41, %v796_v37  ;;  %v595_v48 = vsel %vm478_vm12, %v593_v35, %v594_v38  ;;  %v1060_v1 = vmul.f32 %v1059_v58, %v2004_v56 }
 0x15a   : > { %v597_v49 = vadd.f32 %v595_v48, %v2152_v0  ;;  %v1068_v40 = vstv %s2240_s7  ;;  %v1163_v41 = vstv %s2246_s8  ;;  %s2316_s7 = sld [smem:[#allocation8 + $0x52]] }
 0x15b   : > { %893 = vrot.lane.b32.xlu0 %v891_v42, %s1834_s18  ;;  %771 = vrot.lane.b32.xlu2 %v769_v43, %s1837_s28  ;;  %v738_v42 = vstv %s2253_s9  ;;  %v1164_v48 = vmul.f32 %v1163_v41, %v2004_v56  ;;  %s2320_s8 = sld [smem:[#allocation8 + $0x51]] }
 0x15c   : > { %v606_v52 = vadd.f32 %v604_v51, %v597_v49  ;;  %789 = vrot.lane.b32.xlu1 %v787_v50, %s1839_s19  ;;  %v739_v49 = vmul.f32 %v738_v42, %v2077_v61  ;;  %s2333_s9 = sld [smem:[#allocation8 + $0x5]] }
 0x15d   : > { %v724_v54 = vpop.permute.xlu0 %723  ;;  %v2221_v55 = vpop.permute.xlu2 %827 }
 0x15e   : > { %v620_v31 = vpop.permute.xlu1 %619  ;;  %v615_v57 = vadd.f32 %v613_v53, %v606_v52  ;;  %v725_v24 = vrot.slane %v724_v54, 1  ;;  %v1181_v53 = vstv %s2269_s10  ;;  %v829_v58 = vrot.slane %v2221_v55, 1  ;;  %s2337_s10 = sld [smem:[#allocation8 + $0x59]] }
 0x15f   : > { %v621_v60 = vrot.slane %v620_v31, 1  ;;  %v1182_v63 = vmul.f32 %v1181_v53, %v2004_v56 }
 0x160   : > { %v726_v34 = vsel %vm498_vm14, %v724_v54, %v725_v24  ;;  %v830_v7 = vsel %vm488_vm13, %v2221_v55, %v829_v58  ;;  %v1098_v55 = vstv %s2287_s13  ;;  %s2350_s13 = sld [smem:[#allocation8 + $0x45]] }
 0x161   : > { %v622_v0 = vsel %vm508_vm15, %v620_v31, %v621_v60  ;;  %v967_v60 = vstv %s2276_s12  ;;  %s2345_s12 = sld [smem:[#allocation8 + $0x58]] }
 0x162   : > { %v624_v3 = vadd.f32 %v622_v0, %v615_v57  ;;  %v1089_v57 = vstv %s2273_s11  ;;  %s2342_s11 = sld [smem:[#allocation8 + $0x35]] }
 0x163   : > { %1062 = vrot.lane.b32.xlu0 %v1060_v1, %s1834_s18  ;;  %857 = vrot.lane.b32.xlu2 %v855_v2, %s1836_s22 }
 0x164   : > { %875 = vrot.lane.b32.xlu1 %v873_v4, %s1835_s21  ;;  %v2242_v8 = vadd.f32 %v626_v6, %v624_v3  ;;  %v1090_v3 = vmul.f32 %v1089_v57, %v2077_v61  ;;  %v968_v6 = vmul.f32 %v967_v60, %v2077_v61  ;;  %v1021_v60 = vstv %s2333_s9  ;;  %s1845_s9 = smov 122  }
 0x165   : > { %v810_v5 = vpop.permute.xlu0 %809  ;;  %v914_v9 = vpop.permute.xlu2 %913 }
 0x166   : > { %v811_v14 = vrot.slane %v810_v5, 1  ;;  %v915_v15 = vrot.slane %v914_v9, 1  ;;  %v706_v16 = vpop.permute.xlu1 %705 }
 0x167   : > { %v707_v19 = vrot.slane %v706_v16, 1 }
 0x168   : > { %v812_v20 = vsel %vm468_vm11, %v810_v5, %v811_v14  ;;  %v916_v21 = vsel %vm458_vm10, %v914_v9, %v915_v15 }
 0x169   : > { %v814_v25 = vadd.f32 %v812_v20, %v805_v47  ;;  %v918_v26 = vadd.f32 %v916_v21, %v909_v18  ;;  %v708_v28 = vsel %vm478_vm12, %v706_v16, %v707_v19  ;;  %v985_v16 = vstv %s2294_s23  ;;  %s2367_s23 = sld [smem:[#allocation8 + $0x5a]] }
 0x16a   : > { %v710_v29 = vadd.f32 %v708_v28, %v701_v45  ;;  %v1069_v45 = vmul.f32 %v1068_v40, %v2004_v56  ;;  %v1080_v18 = vstv %s2297_s26  ;;  %v851_v19 = vstv %s2301_s27  ;;  %s2372_s26 = sld [smem:[#allocation8 + $0x5f]] }
 0x16b   : > { %1175 = vrot.lane.b32.xlu0 %v1173_v22, %s1834_s18  ;;  %884 = vrot.lane.b32.xlu2 %v882_v23, %s1837_s28  ;;  %v1099_v20 = vmul.f32 %v1098_v55, %v2077_v61  ;;  %v986_v21 = vmul.f32 %v985_v16, %v2077_v61  ;;  %v1081_v23 = vmul.f32 %v1080_v18, %v2077_v61  ;;  %v1193_v40 = vstv %s2323_s24  ;;  %s1621_s27 = sld [smem:[#allocation8 + $0x60]]  ;;  %s1844_s24 = smov 123  }
 0x16c   : > { %v719_v33 = vadd.f32 %v717_v32, %v710_v29  ;;  %902 = vrot.lane.b32.xlu1 %v900_v30, %s1839_s19  ;;  %v852_v24 = vmul.f32 %v851_v19, %v2077_v61  ;;  %v1107_v30 = vstv %s2316_s7  ;;  %s1842_s7 = smov 125  }
 0x16d   : > { %v837_v35 = vpop.permute.xlu0 %836  ;;  %v2267_v36 = vpop.permute.xlu2 %940  ;;  %v1108_v41 = vmul.f32 %v1107_v30, %v2077_v61 }
 0x16e   : > { %v733_v37 = vpop.permute.xlu1 %732  ;;  %v728_v38 = vadd.f32 %v726_v34, %v719_v33  ;;  %v838_v0 = vrot.slane %v837_v35, 1 }
 0x16f   : > { %v734_v10 = vrot.slane %v733_v37, 1 }
 0x170   : > { %v839_v9 = vsel %vm498_vm14, %v837_v35, %v838_v0  ;;  %v994_v35 = vstv %s2320_s8  ;;  %s1843_s8 = smov 124  }
 0x171   : > { %v735_v43 = vsel %vm508_vm15, %v733_v37, %v734_v10  ;;  %v942_v37 = vrot.slane %v2267_v36, 1 }
 0x172   : > { %v737_v47 = vadd.f32 %v735_v43, %v728_v38 }
 0x173   : > { %979 = vrot.lane.b32.xlu0 %v977_v44, %s1838_s5  ;;  %1071 = vrot.lane.b32.xlu2 %v1069_v45, %s1839_s19  ;;  %v995_v45 = vmul.f32 %v994_v35, %v2077_v61 }
 0x174   : > { %1166 = vrot.lane.b32.xlu1 %v1164_v48, %s1837_s28  ;;  %v2289_v50 = vadd.f32 %v739_v49, %v737_v47  ;;  %v1194_v49 = vmul.f32 %v1193_v40, %v2077_v61 }
 0x175   : > { %v923_v51 = vpop.permute.xlu0 %922  ;;  %v2291_v52 = vpop.permute.xlu2 %1035 }
 0x176   : > { %v924_v54 = vrot.slane %v923_v51, 1  ;;  %v819_v31 = vpop.permute.xlu1 %818 }
 0x177   : > { %v820_v59 = vrot.slane %v819_v31, 1 }
 0x178   : > { %v925_v62 = vsel %vm468_vm11, %v923_v51, %v924_v54  ;;  %v943_v51 = vsel %vm488_vm13, %v2267_v36, %v942_v37  ;;  %v964_v36 = vstv %s2342_s11  ;;  %s1525_s11 = sshll.u32 %s1962_s4, 1 }
 0x179   : > { %v927_v1 = vadd.f32 %v925_v62, %v918_v26  ;;  %v821_v2 = vsel %vm478_vm12, %v819_v31, %v820_v59 }
 0x17a   : > { %v823_v4 = vadd.f32 %v821_v2, %v814_v25  ;;  %v1134_v25 = vstv %s2313_s6  ;;  %v1003_v2 = vstv %s2345_s12  ;;  %s1608_s6 = sld [smem:[#allocation8 + $0x53]]  ;;  %s1626_s12 = sshll.u32 %s1890_s2, 1 }
 0x17b   : > { %1092 = vrot.lane.b32.xlu0 %v1090_v3, %s1838_s5  ;;  %1184 = vrot.lane.b32.xlu2 %v1182_v63, %s1839_s19  ;;  %v1135_v38 = vmul.f32 %v1134_v25, %v2004_v56  ;;  %v1037_v3 = vrot.slane %v2291_v52, 1  ;;  %v1004_v16 = vmul.f32 %v1003_v2, %v2077_v61  ;;  %s203_s2 = scalar_lea.vmem [#allocation9], %s1525_s11 }
 0x17c   : > { %v832_v5 = vadd.f32 %v830_v7, %v823_v4  ;;  %970 = vrot.lane.b32.xlu1 %v968_v6, %s1836_s22  ;;  %v1202_v7 = vstv %s2350_s13 }
 0x17d   : > { %v950_v12 = vpop.permute.xlu0 %949  ;;  %v1149_v13 = vpop.permute.xlu2 %1148  ;;  %v1203_v18 = vmul.f32 %v1202_v7, %v2077_v61 }
 0x17e   : > { %v846_v14 = vpop.permute.xlu1 %845  ;;  %v841_v15 = vadd.f32 %v839_v9, %v832_v5  ;;  %v1150_v32 = vrot.slane %v1149_v13, 1  ;;  %v951_v42 = vrot.slane %v950_v12, 1  ;;  %v1022_v9 = vmul.f32 %v1021_v60, %v2004_v56 }
 0x17f   : > { %v847_v17 = vrot.slane %v846_v14, 1  ;;  %v1038_v56 = vsel %vm468_vm11, %v2291_v52, %v1037_v3 }
 0x180   : > { %v1151_v47 = vsel %vm468_vm11, %v1149_v13, %v1150_v32  ;;  %v952_v57 = vsel %vm498_vm14, %v950_v12, %v951_v42  ;;  %v965_v12 = vmul.f32 %v964_v36, %v2077_v61  ;;  %v1125_v42 = vstv %s1621_s27 }
 0x181   : > { %v848_v11 = vsel %vm508_vm15, %v846_v14, %v847_v17 }
 0x182   : > { %v850_v22 = vadd.f32 %v848_v11, %v841_v15 }
 0x183   : > { %1101 = vrot.lane.b32.xlu0 %v1099_v20, %s1835_s21  ;;  %988 = vrot.lane.b32.xlu2 %v986_v21, %s1835_s21 }
 0x184   : > { %1083 = vrot.lane.b32.xlu1 %v1081_v23, %s1836_s22  ;;  %v2339_v26 = vadd.f32 %v852_v24, %v850_v22  ;;  %v1229_v23 = vstv %s2367_s23  ;;  %v1012_v24 = vstv %s2372_s26  ;;  %s1428_s26 = scalar_lea.hbm %s2530_s3, %s1626_s12 }
 0x185   : > { %v1140_v28 = vpop.permute.xlu0 %1139  ;;  %v959_v29 = vpop.permute.xlu2 %958  ;;  %s1432_s27 = sshll.u32 %s1428_s26, 4  ;;  %s1433_s27 = int_to_ptr.hbm [resolvable:$true] %s1432_s27 }
 0x186   : > { %v1141_v33 = vrot.slane %v1140_v28, 1  ;;  %v932_v34 = vpop.permute.xlu1 %931  ;;  %v960_v53 = vrot.slane %v959_v29, 1 }
 0x187   : > { %v933_v39 = vrot.slane %v932_v34, 1 }
 0x188   : > { %v1142_v10 = vsel %vm458_vm10, %v1140_v28, %v1141_v33  ;;  %v961_v4 = vsel %vm508_vm15, %v959_v29, %v960_v53  ;;  %v1230_v33 = vmul.f32 %v1229_v23, %v2077_v61 }
 0x189   : > { %v1144_v43 = vadd.f32 %v1142_v10, %v1135_v38  ;;  %v934_v44 = vsel %vm478_vm12, %v932_v34, %v933_v39  ;;  %v1013_v34 = vmul.f32 %v1012_v24, %v2077_v61 }
 0x18a   : > { %v936_v48 = vadd.f32 %v934_v44, %v927_v1  ;;  %v1116_v1 = vstv %s2337_s10  ;;  %v1220_v44 = vstv %s1608_s6  ;;  %s2485_s10 = sld [smem:[#allocation3]]  ;;  %s1418_s6 = scalar_lea.sflag [#allocation6], %s1962_s4 }
 0x18b   : > { %1110 = vrot.lane.b32.xlu0 %v1108_v41, %s1837_s28  ;;  %997 = vrot.lane.b32.xlu2 %v995_v45, %s1837_s28  ;;  %v2362_v54 = vadd.f32 %v1151_v47, %v1144_v43  ;;  %v1117_v55 = vmul.f32 %v1116_v1, %v2077_v61  ;;  %v1126_v47 = vmul.f32 %v1125_v42, %v2077_v61 }
 0x18c   : > { %v945_v31 = vadd.f32 %v943_v51, %v936_v48  ;;  %1196 = vrot.lane.b32.xlu1 %v1194_v49, %s1836_s22  ;;  %s2377_s22 = sld [smem:[#allocation8 + $0x4c]]  ;;  %v1221_v49 = vmul.f32 %v1220_v44, %v2077_v61 }
 0x18d   : > { %v1054_v58 = vpop.permute.xlu0 %1053  ;;  %v519_v59 = vpop.permute.xlu2 %518 }
 0x18e   : > { %v954_v62 = vadd.f32 %v952_v57, %v945_v31  ;;  %v520_v63 = vrot.slane %v519_v59, 1  ;;  %v1027_v0 = vpop.permute.xlu1 %1026  ;;  %v1055_v25 = vrot.slane %v1054_v58, 1 }
 0x18f   : > { %v1028_v6 = vrot.slane %v1027_v0, 1 }
 0x190   : > { %v521_v5 = vsel %vm458_vm10, %v519_v59, %v520_v63  ;;  %v963_v13 = vadd.f32 %v961_v4, %v954_v62  ;;  %v1056_v38 = vsel %vm488_vm13, %v1054_v58, %v1055_v25 }
 0x191   : > { %v523_v14 = vadd.f32 %v521_v5, %v2191_v27  ;;  %v1029_v15 = vsel %vm458_vm10, %v1027_v0, %v1028_v6 }
 0x192   : > { %v1031_v17 = vadd.f32 %v1029_v15, %v1022_v9  ;;  %v2387_v19 = vadd.f32 %v965_v12, %v963_v13  ;;  %v1211_v29 = vstv %s2377_s22  ;;  %s1430_s22 = sshll.u32 %s203_s2, 4  ;;  %s1431_s22 = int_to_ptr.vmem [resolvable:$true] %s1430_s22 }
 0x193   : > { %1119 = vrot.lane.b32.xlu0 %v1117_v55, %s1834_s18  ;;  %1006 = vrot.lane.b32.xlu2 %v1004_v16, %s1834_s18  ;;  %v1212_v37 = vmul.f32 %v1211_v29, %v2077_v61 }
 0x194   : > { %1205 = vrot.lane.b32.xlu1 %v1203_v18, %s1838_s5  ;;  %v1040_v27 = vadd.f32 %v1038_v56, %v1031_v17  ;;  %s1622_s5 = sld [smem:[#allocation8 + $0x61]] }
 0x195   : > { %v528_v11 = vpop.permute.xlu0 %527  ;;  %v546_v20 = vpop.permute.xlu2 %545 }
 0x196   : > { %v529_v21 = vrot.slane %v528_v11, 1  ;;  %v1045_v22 = vpop.permute.xlu1 %1044  ;;  %v547_v57 = vrot.slane %v546_v20, 1 }
 0x197   : > { %v1046_v28 = vrot.slane %v1045_v22, 1 }
 0x198   : > { %v530_v52 = vsel %vm468_vm11, %v528_v11, %v529_v21 }
 0x199   : > { %v532_v30 = vadd.f32 %v530_v52, %v523_v14  ;;  %v1047_v32 = vsel %vm478_vm12, %v1045_v22, %v1046_v28 }
 0x19a   : > { %v1049_v35 = vadd.f32 %v1047_v32, %v1040_v27  ;;  %v1238_v59 = vstv %s1622_s5  ;;  %s1772_s5 = sshra.s32 %s1433_s27, 4  ;;  %s1773_s5 = int_to_ptr.hbm [resolvable:$true] %s1772_s5 }
 0x19b   : > { %1232 = vrot.lane.b32.xlu0 %v1230_v33, %s1834_s18  ;;  %1015 = vrot.lane.b32.xlu2 %v1013_v34, %s1839_s19  ;;  %v1239_v63 = vmul.f32 %v1238_v59, %v2077_v61  ;;  %s1840_s18 = smov 127   ;;  %p1779_p9 = scmp.lt.s32.totalorder %s1773_s5, %s2530_s3 }
 0x19c   : > { %1214 = vrot.lane.b32.xlu1 %v1212_v37, %s1835_s21  ;;  %v2406_v39 = vadd.f32 %v1056_v38, %v1049_v35  ;;  %s2437_s21 = sld [smem:[#allocation8 + $0x36]] }
 0x19d   : > { %v555_v40 = vpop.permute.xlu0 %554  ;;  %v632_v10 = vpop.permute.xlu2 %631 }
 0x19e   : > { %v1158_v41 = vpop.permute.xlu1 %1157  ;;  %v556_v60 = vrot.slane %v555_v40, 1  ;;  %v633_v7 = vrot.slane %v632_v10, 1 }
 0x19f   : > { %v1159_v43 = vrot.slane %v1158_v41, 1 }
 0x1a0   : > { %v557_v1 = vsel %vm498_vm14, %v555_v40, %v556_v60  ;;  %v634_v61 = vsel %vm458_vm10, %v632_v10, %v633_v7 }
 0x1a1   : > { %v1160_v45 = vsel %vm478_vm12, %v1158_v41, %v1159_v43  ;;  %v636_v16 = vadd.f32 %v634_v61, %v2242_v8 }
 0x1a2   : > { %v2411_v48 = vadd.f32 %v1160_v45, %v2362_v54  ;;  %v548_v54 = vsel %vm488_vm13, %v546_v20, %v547_v57 }
 0x1a3   : > { %1128 = vrot.lane.b32.xlu2 %v1126_v47, %s1839_s19 }
 0x1a4   : > { %1223 = vrot.lane.b32.xlu1 %v1221_v49, %s1837_s28  ;;  %s1841_s28 = smov 126  }
 0x1a5   : > { %v641_v51 = vpop.permute.xlu0 %640  ;;  %v659_v53 = vpop.permute.xlu2 %658 }
 0x1a6   : > { %v537_v31 = vpop.permute.xlu1 %536  ;;  %v642_v9 = vrot.slane %v641_v51, 1  ;;  %v660_v18 = vrot.slane %v659_v53, 1 }
 0x1a7   : > { %v538_v58 = vrot.slane %v537_v31, 1 }
 0x1a8   : > { %v643_v14 = vsel %vm468_vm11, %v641_v51, %v642_v9  ;;  %v661_v21 = vsel %vm488_vm13, %v659_v53, %v660_v18 }
 0x1a9   : > { %v539_v36 = vsel %vm478_vm12, %v537_v31, %v538_v58  ;;  %v645_v27 = vadd.f32 %v643_v14, %v636_v16 }
 0x1aa   : > { %v541_v62 = vadd.f32 %v539_v36, %v532_v30 }
 0x1ac   : > { %v550_v0 = vadd.f32 %v548_v54, %v541_v62  ;;  %1241 = vrot.lane.b32.xlu1 %v1239_v63, %s1839_s19  ;;  %s1580_s19 = sld [smem:[#allocation8 + $0x37]] }
 0x1ad   : > { %v668_v2 = vpop.permute.xlu0 %667  ;;  %v745_v3 = vpop.permute.xlu2 %744 }
 0x1ae   : > { %v564_v4 = vpop.permute.xlu1 %563  ;;  %v559_v6 = vadd.f32 %v557_v1, %v550_v0  ;;  %v669_v22 = vrot.slane %v668_v2, 1  ;;  %v746_v52 = vrot.slane %v745_v3, 1 }
 0x1af   : > { %v565_v5 = vrot.slane %v564_v4, 1 }
 0x1b0   : > { %v670_v29 = vsel %vm498_vm14, %v668_v2, %v669_v22  ;;  %v747_v35 = vsel %vm458_vm10, %v745_v3, %v746_v52 }
 0x1b1   : > { %v566_v12 = vsel %vm508_vm15, %v564_v4, %v565_v5  ;;  %v749_v43 = vadd.f32 %v747_v35, %v2289_v50 }
 0x1b2   : > { %v2422_v13 = vadd.f32 %v566_v12, %v559_v6 }
 0x1b5   : > { %v754_v15 = vpop.permute.xlu0 %753  ;;  %v772_v55 = vpop.permute.xlu2 %771 }
 0x1b6   : > { %v650_v17 = vpop.permute.xlu1 %649  ;;  %v755_v8 = vrot.slane %v754_v15, 1  ;;  %v773_v45 = vrot.slane %v772_v55, 1 }
 0x1b7   : > { %v651_v56 = vrot.slane %v650_v17, 1 }
 0x1b8   : > { %v756_v10 = vsel %vm468_vm11, %v754_v15, %v755_v8  ;;  %v774_v31 = vsel %vm488_vm13, %v772_v55, %v773_v45 }
 0x1b9   : > { %v652_v11 = vsel %vm478_vm12, %v650_v17, %v651_v56  ;;  %v758_v49 = vadd.f32 %v756_v10, %v749_v43 }
 0x1ba   : > { %v654_v20 = vadd.f32 %v652_v11, %v645_v27  ;;  %v1077_v27 = vstv %s2437_s21 }
 0x1bc   : > { %v663_v23 = vadd.f32 %v661_v21, %v654_v20 }
 0x1bd   : > { %v781_v24 = vpop.permute.xlu0 %780  ;;  %v858_v25 = vpop.permute.xlu2 %857 }
 0x1be   : > { %v677_v28 = vpop.permute.xlu1 %676  ;;  %v672_v32 = vadd.f32 %v670_v29, %v663_v23  ;;  %v782_v57 = vrot.slane %v781_v24, 1  ;;  %v859_v62 = vrot.slane %v858_v25, 1 }
 0x1bf   : > { %v678_v30 = vrot.slane %v677_v28, 1 }
 0x1c0   : > { %v783_v50 = vsel %vm498_vm14, %v781_v24, %v782_v57  ;;  %v860_v3 = vsel %vm458_vm10, %v858_v25, %v859_v62  ;;  %v1712_v25 = vld [vmem:[#allocation2 + $0x3] sm:$0x7] }
 0x1c1   : > { %v679_v33 = vsel %vm508_vm15, %v677_v28, %v678_v30  ;;  %v862_v61 = vadd.f32 %v860_v3, %v2339_v26  ;;  %v1078_v28 = vmul.f32 %v1712_v25, %v1077_v27 }
 0x1c2   : > { %v681_v34 = vadd.f32 %v679_v33, %v672_v32 }
 0x1c4   : > { %v1257_v37 = vperm.slane %v681_v34, 2  ;;  %v1256_v38 = vperm.slane %v681_v34, 1  ;;  %v1255_v40 = vperm.slane %v681_v34, 0 }
 0x1c5   : > { %v867_v41 = vpop.permute.xlu0 %866  ;;  %v885_v42 = vpop.permute.xlu2 %884 }
 0x1c6   : > { %v763_v44 = vpop.permute.xlu1 %762  ;;  %1262 = vrot.lane.b32.xlu0 %v1257_v37, %s1840_s18  ;;  %1260 = vrot.lane.b32.xlu2 %v1256_v38, %s1840_s18  ;;  %v868_v0 = vrot.slane %v867_v41, 1  ;;  %v886_v16 = vrot.slane %v885_v42, 1 }
 0x1c7   : > { %v764_v47 = vrot.slane %v763_v44, 1  ;;  %1258 = vrot.lane.b32.xlu1 %v1255_v40, %s1840_s18  ;;  %s1774_s18 = scalar_lea.hbm %s1773_s5, 2 }
 0x1c8   : > { %v869_v5 = vsel %vm468_vm11, %v867_v41, %v868_v0  ;;  %v887_v22 = vsel %vm488_vm13, %v885_v42, %v886_v16  ;;  %p1775_p1 = scmp.ne.s32.totalorder %s1773_s5, %s1774_s18 }
 0x1c9   : > { %v765_v51 = vsel %vm478_vm12, %v763_v44, %v764_v47  ;;  %v871_v18 = vadd.f32 %v869_v5, %v862_v61 }
 0x1ca   : > { %v767_v53 = vadd.f32 %v765_v51, %v758_v49  ;;  %p1776_p4 = pnand %p1775_p1, %p1935_p3 }
 0x1cc   : > { %v776_v58 = vadd.f32 %v774_v31, %v767_v53  ;;  %v1190_v53 = vstv %s1580_s19  ;;  %p1777_p8 = pneg %p1776_p4  ;;  %s1778_s19 = scalar_lea.hbm %s2530_s3, 4 }
 0x1cd   : > { %v894_v59 = vpop.permute.xlu0 %893  ;;  %v1072_v60 = vpop.permute.xlu2 %1071  ;;  %p1780_p10 = scmp.lt.s32.totalorder %s1778_s19, %s1774_s18 }
 0x1ce   : > { %v790_v36 = vpop.permute.xlu1 %789  ;;  %v785_v54 = vadd.f32 %v783_v50, %v776_v58  ;;  %v1073_v14 = vrot.slane %v1072_v60, 1  ;;  %v895_v23 = vrot.slane %v894_v59, 1  ;;  %v1191_v50 = vmul.f32 %v1712_v25, %v1190_v53 }
 0x1cf   : > { %v791_v63 = vrot.slane %v790_v36, 1  ;;  %p1781_p2 = por %p1780_p10, %p1779_p9 }
 0x1d0   : > { %v1074_v21 = vsel %vm508_vm15, %v1072_v60, %v1073_v14  ;;  %v896_v33 = vsel %vm498_vm14, %v894_v59, %v895_v23 }
 0x1d1   : > { %v792_v1 = vsel %vm508_vm15, %v790_v36, %v791_v63  ;;  %p1782_p11 = pnand %p1781_p2, %p1777_p8 }
 0x1d2   : > { %v794_v2 = vadd.f32 %v792_v1, %v785_v54 }
 0x1d4   : > { %v1274_v4 = vperm.slane %v794_v2, 2  ;;  %v1273_v6 = vperm.slane %v794_v2, 1  ;;  %v1272_v7 = vperm.slane %v794_v2, 0 }
 0x1d5   : > { %v1063_v9 = vpop.permute.xlu0 %1062  ;;  %v1185_v12 = vpop.permute.xlu2 %1184 }
 0x1d6   : > { %v1064_v15 = vrot.slane %v1063_v9, 1  ;;  %v876_v55 = vpop.permute.xlu1 %875  ;;  %1279 = vrot.lane.b32.xlu0 %v1274_v4, %s1841_s28  ;;  %1277 = vrot.lane.b32.xlu2 %v1273_v6, %s1841_s28  ;;  %v1186_v45 = vrot.slane %v1185_v12, 1 }
 0x1d7   : > { %v877_v17 = vrot.slane %v876_v55, 1  ;;  %1275 = vrot.lane.b32.xlu1 %v1272_v7, %s1841_s28 }
 0x1d8   : > { %v1065_v56 = vsel %vm498_vm14, %v1063_v9, %v1064_v15  ;;  %v1187_v58 = vsel %vm508_vm15, %v1185_v12, %v1186_v45 }
 0x1d9   : > { %v1067_v11 = vadd.f32 %v1065_v56, %v2406_v39  ;;  %v878_v20 = vsel %vm478_vm12, %v876_v55, %v877_v17 }
 0x1da   : > { %v880_v26 = vadd.f32 %v878_v20, %v871_v18 }
 0x1db   : > { %v1076_v24 = vadd.f32 %v1074_v21, %v1067_v11 }
 0x1dc   : > { %v889_v29 = vadd.f32 %v887_v22, %v880_v26 }
 0x1dd   : > { %v1176_v52 = vpop.permute.xlu0 %1175  ;;  %v989_v30 = vpop.permute.xlu2 %988  ;;  %v1079_v32 = vadd.f32 %v1078_v28, %v1076_v24 }
 0x1de   : > { %v903_v8 = vpop.permute.xlu1 %902  ;;  %v898_v39 = vadd.f32 %v896_v33, %v889_v29  ;;  %v1177_v43 = vrot.slane %v1176_v52, 1  ;;  %v990_v1 = vrot.slane %v989_v30, 1 }
 0x1df   : > { %v904_v34 = vrot.slane %v903_v8, 1 }
 0x1e0   : > { %v1178_v51 = vsel %vm498_vm14, %v1176_v52, %v1177_v43  ;;  %v991_v7 = vsel %vm478_vm12, %v989_v30, %v990_v1 }
 0x1e1   : > { %v905_v35 = vsel %vm508_vm15, %v903_v8, %v904_v34 }
 0x1e2   : > { %v907_v37 = vadd.f32 %v905_v35, %v898_v39 }
 0x1e4   : > { %v1291_v38 = vperm.slane %v907_v37, 2  ;;  %v1290_v40 = vperm.slane %v907_v37, 1  ;;  %v1289_v57 = vperm.slane %v907_v37, 0 }
 0x1e5   : > { %v980_v10 = vpop.permute.xlu0 %979  ;;  %v998_v41 = vpop.permute.xlu2 %997 }
 0x1e6   : > { %v1167_v42 = vpop.permute.xlu1 %1166  ;;  %1296 = vrot.lane.b32.xlu0 %v1291_v38, %s1842_s7  ;;  %1294 = vrot.lane.b32.xlu2 %v1290_v40, %s1842_s7  ;;  %v981_v63 = vrot.slane %v980_v10, 1  ;;  %v999_v4 = vrot.slane %v998_v41, 1 }
 0x1e7   : > { %v1168_v44 = vrot.slane %v1167_v42, 1 }
 0x1e8   : > { %v982_v3 = vsel %vm468_vm11, %v980_v10, %v981_v63  ;;  %v1000_v15 = vsel %vm488_vm13, %v998_v41, %v999_v4 }
 0x1e9   : > { %v1169_v47 = vsel %vm488_vm13, %v1167_v42, %v1168_v44 }
 0x1ea   : > { %v1171_v49 = vadd.f32 %v1169_v47, %v2411_v48 }
 0x1ec   : > { %v1180_v31 = vadd.f32 %v1178_v51, %v1171_v49 }
 0x1ed   : > { %v1093_v59 = vpop.permute.xlu0 %1092  ;;  %v1007_v60 = vpop.permute.xlu2 %1006 }
 0x1ee   : > { %v971_v36 = vpop.permute.xlu1 %970  ;;  %1292 = vrot.lane.b32.xlu0 %v1289_v57, %s1842_s7  ;;  %v1189_v62 = vadd.f32 %v1187_v58, %v1180_v31  ;;  %v1008_v5 = vrot.slane %v1007_v60, 1  ;;  %v1094_v11 = vrot.slane %v1093_v59, 1 }
 0x1ef   : > { %v972_v54 = vrot.slane %v971_v36, 1 }
 0x1f0   : > { %v2455_v0 = vadd.f32 %v1191_v50, %v1189_v62  ;;  %v1009_v18 = vsel %vm498_vm14, %v1007_v60, %v1008_v5  ;;  %v1095_v25 = vsel %vm468_vm11, %v1093_v59, %v1094_v11 }
 0x1f1   : > { %v973_v48 = vsel %vm458_vm10, %v971_v36, %v972_v54 }
 0x1f2   : > { %v975_v2 = vadd.f32 %v973_v48, %v2387_v19 }
 0x1f4   : > { %v984_v6 = vadd.f32 %v982_v3, %v975_v2 }
 0x1f5   : > { %v1102_v9 = vpop.permute.xlu0 %1101  ;;  %v1016_v12 = vpop.permute.xlu2 %1015 }
 0x1f6   : > { %v993_v61 = vadd.f32 %v991_v7, %v984_v6  ;;  %v1084_v14 = vpop.permute.xlu1 %1083  ;;  %v1017_v55 = vrot.slane %v1016_v12, 1  ;;  %v1103_v28 = vrot.slane %v1102_v9, 1 }
 0x1f7   : > { %v1085_v16 = vrot.slane %v1084_v14, 1 }
 0x1f8   : > { %v1002_v17 = vadd.f32 %v1000_v15, %v993_v61  ;;  %v1018_v27 = vsel %vm508_vm15, %v1016_v12, %v1017_v55  ;;  %v1104_v8 = vsel %vm478_vm12, %v1102_v9, %v1103_v28 }
 0x1f9   : > { %v1086_v19 = vsel %vm458_vm10, %v1084_v14, %v1085_v16 }
 0x1fa   : > { %v1011_v56 = vadd.f32 %v1009_v18, %v1002_v17  ;;  %v1088_v21 = vadd.f32 %v1086_v19, %v1079_v32 }
 0x1fc   : > { %v1020_v20 = vadd.f32 %v1018_v27, %v1011_v56  ;;  %v1097_v52 = vadd.f32 %v1095_v25, %v1088_v21  ;;  %v304_v56 = vand.u32 127, %v303_v46 }
 0x1fd   : > { %v1111_v26 = vpop.permute.xlu0 %1110  ;;  %v1129_v30 = vpop.permute.xlu2 %1128 }
 0x1fe   : > { %v1197_v22 = vpop.permute.xlu1 %1196  ;;  %v1308_v23 = vperm.slane %v1020_v20, 2  ;;  %v1307_v24 = vperm.slane %v1020_v20, 1  ;;  %v1112_v29 = vrot.slane %v1111_v26, 1  ;;  %v1106_v34 = vadd.f32 %v1104_v8, %v1097_v52 }
 0x1ff   : > { %v1130_v32 = vrot.slane %v1129_v30, 1  ;;  %v1306_v40 = vperm.slane %v1020_v20, 0  ;;  %v1198_v51 = vrot.slane %v1197_v22, 1  ;;  %v305_v27 = vadd.s32 128, %v304_v56 }
 0x200   : > { %1313 = vrot.lane.b32.xlu2 %v1308_v23, %s1843_s8  ;;  %1311 = vrot.lane.b32.xlu1 %v1307_v24, %s1843_s8  ;;  %v1113_v33 = vsel %vm488_vm13, %v1111_v26, %v1112_v29  ;;  %v306_v26 = vand.u32 15, %v304_v56 }
 0x201   : > { %v1115_v38 = vadd.f32 %v1113_v33, %v1106_v34  ;;  %v1131_v42 = vsel %vm508_vm15, %v1129_v30, %v1130_v32  ;;  %v1199_v31 = vsel %vm458_vm10, %v1197_v22, %v1198_v51  ;;  %v307_v21 = vand.u32 15, %v305_v27 }
 0x202   : > { %v1201_v59 = vadd.f32 %v1199_v31, %v2455_v0  ;;  %v316_v24 = vadd.s32 4294967294, %v306_v26  ;;  %v308_v25 = vadd.s32 4294967293, %v306_v26  ;;  %v324_v52 = vadd.s32 4294967295, %v306_v26 }
 0x203   : > { %v317_v22 = vadd.s32 4294967294, %v307_v21  ;;  %v309_v23 = vadd.s32 4294967293, %v307_v21  ;;  %v325_v28 = vadd.s32 4294967295, %v307_v21  ;;  %v1249_v33 = vperm.slane %v2422_v13, 1 }
 0x204   : > { %vm318_vm5 = vcmp.ge.s32.totalorder %v316_v24, 0  ;;  %vm310_vm6 = vcmp.ge.s32.totalorder %v308_v25, 0  ;;  %vm326_vm8 = vcmp.ge.s32.totalorder %v324_v52, 0  ;;  %vm1298_vm10 = vcmask 1022976  }
 0x205   : > { %v1120_v39 = vpop.permute.xlu0 %1119  ;;  %vm319_vm3 = vcmp.ge.s32.totalorder %v317_v22, 0  ;;  %vm311_vm4 = vcmp.ge.s32.totalorder %v309_v23, 0  ;;  %vm327_vm7 = vcmp.ge.s32.totalorder %v325_v28, 0  ;;  %v346_v31 = vadd.s32 2, %v306_v26 }
 0x206   : > { %v1121_v35 = vrot.slane %v1120_v39, 1  ;;  %v1206_v37 = vpop.permute.xlu1 %1205 }
 0x207   : > { %v1207_v53 = vrot.slane %v1206_v37, 1 }
 0x208   : > { %v1122_v10 = vsel %vm498_vm14, %v1120_v39, %v1121_v35  ;;  %1309 = vrot.lane.b32.xlu1 %v1306_v40, %s1843_s8  ;;  %v1248_v39 = vperm.slane %v2422_v13, 0  ;;  %v1253_v40 = vsel %vm311_vm4, %v1249_v33, 0.0 }
 0x209   : > { %v1124_v41 = vadd.f32 %v1122_v10, %v1115_v38  ;;  %v1208_v58 = vsel %vm468_vm11, %v1206_v37, %v1207_v53  ;;  %vm1332_vm11 = vcmask 1006592  }
 0x20a   : > { %v1210_v62 = vadd.f32 %v1208_v58, %v1201_v59 }
 0x20b   : > { %v1133_v43 = vadd.f32 %v1131_v42, %v1124_v41  ;;  %v339_v41 = vadd.s32 1, %v307_v21  ;;  %v1252_v42 = vsel %vm310_vm6, %v1248_v39, 0.0 }
 0x20d   : > { %v1325_v44 = vperm.slane %v1133_v43, 2  ;;  %v1324_v45 = vperm.slane %v1133_v43, 1  ;;  %v1323_v47 = vperm.slane %v1133_v43, 0  ;;  %v1233_v63 = vpop.permute.xlu0 %1232 }
 0x20e   : > { %v1215_v49 = vpop.permute.xlu1 %1214  ;;  %v1234_v48 = vrot.slane %v1233_v63, 1 }
 0x20f   : > { %1330 = vrot.lane.b32.xlu0 %v1325_v44, %s1844_s24  ;;  %1328 = vrot.lane.b32.xlu2 %v1324_v45, %s1844_s24  ;;  %v1216_v57 = vrot.slane %v1215_v49, 1  ;;  %v338_v44 = vadd.s32 1, %v306_v26 }
 0x210   : > { %1326 = vrot.lane.b32.xlu1 %v1323_v47, %s1844_s24  ;;  %v1235_v4 = vsel %vm498_vm14, %v1233_v63, %v1234_v48  ;;  %v347_v47 = vadd.s32 2, %v307_v21 }
 0x211   : > { %v1217_v36 = vsel %vm478_vm12, %v1215_v49, %v1216_v57  ;;  %vm343_vm12 = vcmp.lt.s32.totalorder %v339_v41, 16 }
 0x212   : > { %v1219_v1 = vadd.f32 %v1217_v36, %v1210_v62  ;;  %vm351_vm14 = vcmp.lt.s32.totalorder %v347_v47, 16 }
 0x216   : > { %v1224_v60 = vpop.permute.xlu1 %1223 }
 0x217   : > { %v1225_v50 = vrot.slane %v1224_v60, 1 }
 0x219   : > { %v1226_v54 = vsel %vm488_vm13, %v1224_v60, %v1225_v50  ;;  %vm342_vm13 = vcmp.lt.s32.totalorder %v338_v44, 16 }
 0x21a   : > { %v1228_v2 = vadd.f32 %v1226_v54, %v1219_v1  ;;  %v355_v54 = vadd.s32 3, %v307_v21 }
 0x21c   : > { %v1237_v7 = vadd.f32 %v1235_v4, %v1228_v2  ;;  %v354_v2 = vadd.s32 3, %v306_v26 }
 0x21e   : > { %v1242_v3 = vpop.permute.xlu1 %1241 }
 0x21f   : > { %v1243_v6 = vrot.slane %v1242_v3, 1 }
 0x220   : > { %v1261_v55 = vpop.permute.xlu2 %1260 }
 0x221   : > { %v1244_v5 = vsel %vm508_vm15, %v1242_v3, %v1243_v6  ;;  %vm350_vm15 = vcmp.lt.s32.totalorder %v346_v31, 16 }
 0x222   : > { %v1246_v9 = vadd.f32 %v1244_v5, %v1237_v7 }
 0x224   : > { %v1342_v0 = vperm.slane %v1246_v9, 2  ;;  %v1341_v12 = vperm.slane %v1246_v9, 1  ;;  %v1340_v61 = vperm.slane %v1246_v9, 0 }
 0x226   : > { %1347 = vrot.lane.b32.xlu0 %v1342_v0, %s1845_s9  ;;  %1345 = vrot.lane.b32.xlu2 %v1341_v12, %s1845_s9 }
 0x227   : > { %1343 = vrot.lane.b32.xlu1 %v1340_v61, %s1845_s9 }
 0x230   : > { %v1278_v18 = vpop.permute.xlu2 %1277 }
 0x238   : > { %v1263_v15 = vpop.permute.xlu0 %1262 }
 0x239   : > { %v1259_v14 = vpop.permute.xlu1 %1258  ;;  %v1266_v34 = vsel %vm1264_vm0, %v1261_v55, %v1263_v15 }
 0x23a   : > { %v1265_v32 = vsel %vm1264_vm0, %v1259_v14, %v1261_v55  ;;  %v1270_v37 = vsel %vm319_vm3, %v1266_v34, 0.0  ;;  %vm1349_vm0 = vcmask 998400   ;;  %vm358_vm3 = vcmp.lt.s32.totalorder %v354_v2, 16 }
 0x23b   : > { %v1269_v10 = vsel %vm318_vm5, %v1265_v32, 0.0  ;;  %v1357_v45 = vadd.f32 %v1270_v37, %v1253_v40 }
 0x23c   : > { %v1356_v49 = vadd.f32 %v1269_v10, %v1252_v42 }
 0x240   : > { %v1295_v20 = vpop.permute.xlu2 %1294 }
 0x248   : > { %v1280_v17 = vpop.permute.xlu0 %1279 }
 0x249   : > { %v1276_v16 = vpop.permute.xlu1 %1275  ;;  %v1283_v35 = vsel %vm1281_vm1, %v1278_v18, %v1280_v17  ;;  %v1368_v17 = vstv %s2485_s10 }
 0x24a   : > { %v1282_v38 = vsel %vm1281_vm1, %v1276_v16, %v1278_v18  ;;  %v1287_v43 = vsel %vm327_vm7, %v1283_v35, 0.0  ;;  %vm359_vm1 = vcmp.lt.s32.totalorder %v355_v54, 16 }
 0x24b   : > { %v1286_v13 = vsel %vm326_vm8, %v1282_v38, 0.0  ;;  %v1359_v57 = vadd.f32 %v1357_v45, %v1287_v43 }
 0x24c   : > { %v1358_v60 = vadd.f32 %v1356_v49, %v1286_v13 }
 0x258   : > { %v1297_v11 = vpop.permute.xlu0 %1296 }
 0x259   : > { %v1300_v36 = vsel %vm1298_vm10, %v1295_v20, %v1297_v11 }
 0x25a   : > { %v1314_v30 = vpop.permute.xlu2 %1313  ;;  %v1361_v3 = vadd.f32 %v1359_v57, %v1300_v36 }
 0x260   : > { %v1293_v8 = vpop.permute.xlu0 %1292 }
 0x261   : > { %v1299_v62 = vsel %vm1298_vm10, %v1293_v8, %v1295_v20 }
 0x262   : > { %v1360_v6 = vadd.f32 %v1358_v60, %v1299_v62 }
 0x269   : > { %v1329_v51 = vpop.permute.xlu2 %1328 }
 0x272   : > { %v1312_v19 = vpop.permute.xlu1 %1311 }
 0x273   : > { %v1317_v58 = vsel %vm1315_vm9, %v1312_v19, %v1314_v30 }
 0x274   : > { %v1321_v1 = vsel %vm343_vm12, %v1317_v58, 0.0  ;;  %vm1414_vm12 = vcmp.lt.s32.totalorder %v303_v46, 256 }
 0x275   : > { %v1363_v5 = vadd.f32 %v1361_v3, %v1321_v1 }
 0x27a   : > { %v1310_v29 = vpop.permute.xlu1 %1309 }
 0x27b   : > { %v1316_v50 = vsel %vm1315_vm9, %v1310_v29, %v1312_v19 }
 0x27c   : > { %v1320_v4 = vsel %vm342_vm13, %v1316_v50, 0.0 }
 0x27d   : > { %v1362_v0 = vadd.f32 %v1360_v6, %v1320_v4 }
 0x280   : > { %v1346_v12 = vpop.permute.xlu2 %1345 }
 0x281   : > { %v1331_v53 = vpop.permute.xlu0 %1330 }
 0x282   : > { %v1327_v59 = vpop.permute.xlu1 %1326  ;;  %v1334_v63 = vsel %vm1332_vm11, %v1329_v51, %v1331_v53 }
 0x283   : > { %v1333_v48 = vsel %vm1332_vm11, %v1327_v59, %v1329_v51  ;;  %v1338_v7 = vsel %vm351_vm14, %v1334_v63, 0.0 }
 0x284   : > { %v1337_v9 = vsel %vm350_vm15, %v1333_v48, 0.0  ;;  %v1365_v14 = vadd.f32 %v1363_v5, %v1338_v7 }
 0x285   : > { %v1364_v16 = vadd.f32 %v1362_v0, %v1337_v9 }
 0x298   : > { %v1348_v61 = vpop.permute.xlu0 %1347 }
 0x299   : > { %v1351_v15 = vsel %vm1349_vm0, %v1346_v12, %v1348_v61  ;;  %v1344_v55 = vpop.permute.xlu1 %1343 }
 0x29a   : > { %v1355_v18 = vsel %vm359_vm1, %v1351_v15, 0.0  ;;  %v1350_v56 = vsel %vm1349_vm0, %v1344_v55, %v1346_v12 }
 0x29b   : > { %v1367_v19 = vadd.f32 %v1365_v14, %v1355_v18  ;;  %v1354_v27 = vsel %vm358_vm3, %v1350_v56, 0.0 }
 0x29c   : > { %v1366_v11 = vadd.f32 %v1364_v16, %v1354_v27 }
 0x29d   : > { %v1370_v20 = vadd.f32 %v1368_v17, %v1367_v19 }
 0x29e   : > { %v1369_v21 = vadd.f32 %v1368_v17, %v1366_v11 }
 0x29f   : > { %v1624_v26 = vmul.f32 -1.442695, %v1370_v20 }
 0x2a0   : > { %v1623_v22 = vmul.f32 -1.442695, %v1369_v21 }
 0x2a1   : > { %1704 = vpow2.f32 %v1624_v26 }
 0x2a2   : > { %1706 = vpow2.f32 %v1623_v22 }
 0x2a7   : > { %v1705_v23 = vpop.eup %1704 }
 0x2a8   : > { %v1707_v24 = vpop.eup %1706  ;;  %v1378_v25 = vadd.f32 1.0, %v1705_v23 }
 0x2a9   : > { %v1377_v28 = vadd.f32 1.0, %v1707_v24 }
 0x2aa   : > { %1708 = vrcp.f32 %v1378_v25  ;;  %v1405_v39 = vand.u32 2147483648, %v1378_v25  ;;  %v1403_v35 = vand.u32 2147483647, %v1378_v25  ;;  %vm1399_vm6 = vweird.f32 %v1378_v25 }
 0x2ab   : > { %1710 = vrcp.f32 %v1377_v28  ;;  %v1390_v38 = vand.u32 2147483648, %v1377_v28  ;;  %v1388_v40 = vand.u32 2147483647, %v1377_v28  ;;  %vm1384_vm7 = vweird.f32 %v1377_v28 }
 0x2ac   : > { %v1406_v42 = vor.u32 1.1754944e-38, %v1405_v39  ;;  %vm1404_vm10 = vcmp.eq.f32.partialorder %v1403_v35, 8.507059e+37 }
 0x2ad   : > { %v1391_v45 = vor.u32 1.1754944e-38, %v1390_v38  ;;  %vm1389_vm11 = vcmp.eq.f32.partialorder %v1388_v40, 8.507059e+37 }
 0x2b0   : > { %v1709_v29 = vpop.eup %1708 }
 0x2b1   : > { %v1711_v52 = vpop.eup %1710  ;;  %v1395_v30 = vmul.f32 %v1709_v29, %v1378_v25  ;;  %vm1400_vm4 = vweird.f32 %v1709_v29 }
 0x2b2   : > { %v1380_v8 = vmul.f32 %v1711_v52, %v1377_v28  ;;  %vm1385_vm5 = vweird.f32 %v1711_v52  ;;  %vm1401_vm8 = vmor %vm1399_vm6, %vm1400_vm4 }
 0x2b3   : > { %v1396_v33 = vsub.f32 1.0, %v1395_v30  ;;  %vm1386_vm9 = vmor %vm1384_vm7, %vm1385_vm5 }
 0x2b4   : > { %v1381_v34 = vsub.f32 1.0, %v1380_v8 }
 0x2b5   : > { %v1397_v32 = vmul.f32 %v1709_v29, %v1396_v33 }
 0x2b6   : > { %v1382_v37 = vmul.f32 %v1711_v52, %v1381_v34 }
 0x2b7   : > { %v1398_v10 = vadd.f32 %v1709_v29, %v1397_v32 }
 0x2b8   : > { %v1383_v41 = vadd.f32 %v1711_v52, %v1382_v37 }
 0x2b9   : > { %v1402_v43 = vsel %vm1401_vm8, %v1709_v29, %v1398_v10 }
 0x2ba   : > { %v1387_v44 = vsel %vm1386_vm9, %v1711_v52, %v1383_v41  ;;  %v1407_v13 = vsel %vm1404_vm10, %v1406_v42, %v1402_v43 }
 0x2bb   : > { %v1411_v47 = vrot.slane %v1407_v13, 7  ;;  %v1392_v49 = vsel %vm1389_vm11, %v1391_v45, %v1387_v44 }
 0x2bd   : > { %v1412_v51 = vsel %vm407_vm2, %v1392_v49, %v1411_v47 }
 0x2be   : > { %1416 = vst.msk [vmem:[%s203_s2] sm:$0x3] %vm1414_vm12, %v1412_v51 }
 0x2bf   : > { %1785 = shalt.err (!%p1782_p11)
}
 0x2c0   : > { %1636 = dma.vmem_to_hbm [thread:$0]  (%p1935_p3), %s1431_s22, 32, %s1433_s27, %s1418_s6  }
 0x2c1 PF: > { %s1444_s4 = sand.u32 1, %s1816_s14   ;;  %p2540_p12 = scmp.ge.s32.totalorder %s1828_s17, 2 }
 0x2c2   : > { %s1445_s24 = scalar_lea.sflag [#allocation6], %s1444_s4 }
 0x2c3   : > { %p1647_p13 = pnand %p2540_p12, %p1904_p6 }
 0x2c5   : > { %p1648_p0 = pneg %p1647_p13 }
 0x2c7   : > { %1811 = dma.done.wait (%p1648_p0), %s1445_s24, 32  }
 0x2c8   : > { %1813 = vsyncadd (%p1648_p0), %s1445_s24, 4294967264  ;;  %p18_p5 = scmp.ge.s32.totalorder %s1920_s25, 4   ;;  %s2541_s14 = smov %s1820_s15 }
 0x2c9   : > { %s2542_s15 = smov %s1824_s16  ;;  %s2543_s16 = smov %s1930_s29 }
 0x2ca   : > { %s2544_s17 = smov %s1920_s25  ;;  %20 = sbr.rel (!%p18_p5) target bundleno = 8 (0x8), region = 83 }
 0x2cf   :  { %1451 = vsyncpa [#allocation5], 1 }
 0x2d0   :  { %1453 = vsyncpa [#allocation5 + $0x1], 1 }
 0x2d1   :  { %1454 = vsyncpa [#allocation6], 1 }
 0x2d2   :  { %1456 = vsyncpa [#allocation6 + $0x1], 1 }
 0x2d3   :  { %1457 = vsyncpa [#allocation7], 1 }
 0x2d4   :  { %1459 = vsyncpa [#allocation7 + $0x1], 1 }

</bundles_post_ra>
